<compile_context>
chip_gen: v6e
topology: v6e:2x2x1
jax: 0.10.0
libtpu: 0.0.40
codegen_flags: <defaults>
</compile_context>

<pallas_src>
import jax
import jax.numpy as jnp
from jax.experimental import pallas as pl
from jax.experimental.pallas import tpu as pltpu

# ---------------------------------------------------------------------------
# problem sizes (small, consistent with the module: x is (batch, time, dim))
# ---------------------------------------------------------------------------
B = 2            # batch
T = 16           # time
C = 8            # in_channels (dim)
K = 31           # depthwise kernel size (module default)
PAD = (K - 1) // 2
LN_EPS = 1e-5
BN_EPS = 1e-5

CP = 128                                  # channels padded to full lane width
OFF = ((PAD + 7) // 8) * 8                # 8-aligned interior offset in scratch
TAP_BASE = OFF - PAD                      # scratch row where tap 0 starts
SCRATCH_T = ((OFF + T + PAD) + 7) // 8 * 8  # scratch time extent (sublane pad)

# packed small-parameter rows: [dw taps 0..K-1, ba, bg, bn_g, bn_b, b2]
ROW_BA = K
ROW_BG = K + 1
ROW_BN_G = K + 2
ROW_BN_B = K + 3
ROW_B2 = K + 4
N_SMALL = K + 5


def conformer_conv_kernel(
    len_ref,     # SMEM (B,) int32   valid lengths per batch
    x_ref,       # (B, T, CP) f32    input, zero on padded channels
    w1_ref,      # (CP, 2*CP) bf16   fused GLU value|gate weight (LN folded)
    w2_ref,      # (CP, CP)  bf16    second pointwise conv weight (transposed)
    small_ref,   # (N_SMALL, CP) f32 packed dw taps + biases + BN affine
    o_ref,       # (B, T, CP) f32
    glu_ref,     # VMEM scratch (B, SCRATCH_T, CP) f32, zero-halo staging
):
    x = x_ref[...]                                            # (B, T, CP)

    # ---- keep mask derived in-kernel from lengths (built lane-dense once) ---
    t_idx = jax.lax.broadcasted_iota(jnp.int32, (1, T, CP), 1)
    keep = jnp.concatenate(
        [(t_idx < len_ref[b]).astype(jnp.float32) for b in range(B)], axis=0)

    # ---- LayerNorm over the real C channels (affine folded into w1/biases) --
    # Padded channels of x are zero, so plain sums over CP equal sums over C.
    inv_c = 1.0 / C
    s1 = jnp.sum(x, axis=-1, keepdims=True)
    s2 = jnp.sum(x * x, axis=-1, keepdims=True)
    mu = s1 * inv_c
    var = jnp.maximum(s2 * inv_c - mu * mu, 0.0)
    xn = (x - mu) * jax.lax.rsqrt(var + LN_EPS)               # (B, T, CP) f32

    # ---- pointwise conv #1: one (M,128)x(128,256) bf16 matmul, then GLU -----
    h = jnp.dot(xn.reshape(B * T, CP).astype(jnp.bfloat16), w1_ref[...],
                preferred_element_type=jnp.float32)           # (B*T, 2CP) f32
    a = h[:, :CP] + small_ref[ROW_BA:ROW_BA + 1, :]           # value half
    g = h[:, CP:] + small_ref[ROW_BG:ROW_BG + 1, :]           # gate half
    y = (a * jax.nn.sigmoid(g)).reshape(B, T, CP) * keep      # masked GLU out

    # ---- stage into zero-halo VMEM scratch (single 8-aligned bulk store) ----
    glu_ref[:, 0:OFF, :] = jnp.zeros((B, OFF, CP), jnp.float32)
    glu_ref[:, OFF + T:SCRATCH_T, :] = jnp.zeros(
        (B, SCRATCH_T - OFF - T, CP), jnp.float32)
    glu_ref[:, OFF:OFF + T, :] = y

    # ---- depthwise 1-D conv, SAME padding, no bias: 31 taps off the scratch -
    def tap(k, acc):
        w_k = small_ref[pl.ds(k, 1), :]                       # (1, CP) tap row
        seg = glu_ref[:, pl.ds(TAP_BASE + k, T), :]           # (B, T, CP)
        return acc + seg * w_k

    y = jax.lax.fori_loop(0, K, tap, jnp.zeros((B, T, CP), jnp.float32),
                          unroll=True)
    y = y * keep                       # pre-BN mask (affects BN statistics)

    # ---- BatchNorm1d: training-mode batch statistics over (B, T) ------------
    # (includes the masked / zeroed frames, matching the PyTorch module)
    inv_n = 1.0 / (B * T)
    bs1 = jnp.sum(y, axis=(0, 1), keepdims=True)
    bs2 = jnp.sum(y * y, axis=(0, 1), keepdims=True)
    bmu = bs1 * inv_n
    bvar = jnp.maximum(bs2 * inv_n - bmu * bmu, 0.0)
    yn = (y - bmu) * jax.lax.rsqrt(bvar + BN_EPS) \
        * small_ref[ROW_BN_G:ROW_BN_G + 1, :] \
        + small_ref[ROW_BN_B:ROW_BN_B + 1, :]
    # (post-BN mask dropped: masked frames are re-masked at the output)

    # ---- SiLU + pointwise conv #2 (bf16 MXU) + output mask ------------------
    s = yn * jax.nn.sigmoid(yn)
    o = jnp.dot(s.reshape(B * T, CP).astype(jnp.bfloat16), w2_ref[...],
                preferred_element_type=jnp.float32) \
        + small_ref[ROW_B2:ROW_B2 + 1, :]
    o_ref[...] = (o.reshape(B, T, CP) * keep).astype(o_ref.dtype)
    # TODO(synk): FairseqDropout applied as identity (inference semantics).


# ---------------------------------------------------------------------------
# wrapper: parameter folding / packing + lane-dense layout + pallas_call
# ---------------------------------------------------------------------------
def _pad_cols(a):
    return jnp.pad(a, ((0, 0), (0, CP - a.shape[1])))


def prepare_kernel_params(params):
    ln_g, ln_b = params["ln_g"], params["ln_b"]               # (1, C)
    w1, b1 = params["w1"], params["b1"]                       # (C, 2C), (1, 2C)
    wa, wg = w1[:, :C], w1[:, C:]
    ba, bg = b1[:, :C], b1[:, C:]
    # Fold the LayerNorm affine into the first pointwise conv:
    #   (xn * g + b) @ W + c  ==  xn @ (diag(g) W) + (b @ W + c)
    wa_f = ln_g.T * wa
    wg_f = ln_g.T * wg
    ba_f = ba + ln_b @ wa
    bg_f = bg + ln_b @ wg
    # Re-fused value|gate weight: one (CP, 2*CP) matrix; value cols [0:CP),
    # gate cols [CP:2CP) — the in-kernel split at column 128 is tile-aligned.
    w1_packed = jnp.concatenate(
        [jnp.pad(wa_f, ((0, CP - C), (0, CP - C))),
         jnp.pad(wg_f, ((0, CP - C), (0, CP - C)))], axis=1).astype(jnp.bfloat16)
    w2_packed = jnp.pad(params["w2"],
                        ((0, CP - C), (0, CP - C))).astype(jnp.bfloat16)
    small = jnp.concatenate([
        jnp.pad(params["dw"], ((0, 0), (0, CP - C))),         # rows 0..K-1
        _pad_cols(ba_f),                                      # ROW_BA
        _pad_cols(bg_f),                                      # ROW_BG
        _pad_cols(params["bn_g"]),                            # ROW_BN_G (0-pad)
        _pad_cols(params["bn_b"]),                            # ROW_BN_B (0-pad)
        _pad_cols(params["b2"]),                              # ROW_B2
    ], axis=0).astype(jnp.float32)                            # (N_SMALL, CP)
    return w1_packed, w2_packed, small


def conformer_conv_module(x, pad_mask, params):
    """x: (B, T, C) float32, pad_mask: (B, T) bool (True = padding)."""
    w1_p, w2_p, small = prepare_kernel_params(params)

    # Lane-dense channel padding (C -> CP); no time-halo padding needed — the
    # conv halo lives only in the in-kernel VMEM scratch.
    x_p = jnp.pad(x, ((0, 0), (0, 0), (0, CP - C)))            # (B, T, CP)

    # encoder_padding_mask is the standard suffix mask -> per-batch lengths.
    # TODO(synk): arbitrary (non-suffix) masks would need a (B, T, 1) mask input.
    lengths = (T - jnp.sum(pad_mask.astype(jnp.int32), axis=1)).astype(jnp.int32)

    vmem = pl.BlockSpec(memory_space=pltpu.MemorySpace.VMEM)
    smem = pl.BlockSpec(memory_space=pltpu.MemorySpace.SMEM)
    out = pl.pallas_call(
        conformer_conv_kernel,
        out_shape=jax.ShapeDtypeStruct((B, T, CP), jnp.float32),
        in_specs=[smem, vmem, vmem, vmem, vmem],
        out_specs=vmem,
        scratch_shapes=[pltpu.VMEM((B, SCRATCH_T, CP), jnp.float32)],
    )(lengths, x_p, w1_p, w2_p, small)
    return out[..., :C]


# ---------------------------------------------------------------------------
# pure-JAX reference (mirrors the PyTorch forward in (B, T, C) layout, f32)
# ---------------------------------------------------------------------------
def reference(x, pad_mask, params):
    keep = 1.0 - pad_mask.astype(jnp.float32)[:, :, None]
    mu = jnp.mean(x, axis=-1, keepdims=True)
    var = jnp.mean((x - mu) ** 2, axis=-1, keepdims=True)
    xn = (x - mu) / jnp.sqrt(var + LN_EPS) * params["ln_g"] + params["ln_b"]
    h = xn @ params["w1"] + params["b1"]
    a, g = h[..., :C], h[..., C:]
    y = a * jax.nn.sigmoid(g)
    y = y * keep
    yp = jnp.pad(y, ((0, 0), (PAD, PAD), (0, 0)))
    acc = jnp.zeros_like(y)
    for k in range(K):
        acc = acc + yp[:, k:k + T, :] * params["dw"][k, :]
    y = acc * keep
    bmu = jnp.mean(y, axis=(0, 1), keepdims=True)
    bvar = jnp.mean((y - bmu) ** 2, axis=(0, 1), keepdims=True)
    yn = (y - bmu) / jnp.sqrt(bvar + BN_EPS) * params["bn_g"] + params["bn_b"]
    yn = yn * keep
    s = yn * jax.nn.sigmoid(yn)
    o = s @ params["w2"] + params["b2"]
    return o * keep


def make_params(key):
    ks = jax.random.split(key, 8)
    scale = 0.1
    return {
        "ln_g": jnp.ones((1, C), jnp.float32)
                + scale * jax.random.normal(ks[0], (1, C), jnp.float32),
        "ln_b": scale * jax.random.normal(ks[1], (1, C), jnp.float32),
        # Conv1d weight (2C, C, 1) -> stored transposed (C, 2C) for x @ W
        "w1": scale * jax.random.normal(ks[2], (C, 2 * C), jnp.float32),
        "b1": scale * jax.random.normal(ks[3], (1, 2 * C), jnp.float32),
        # depthwise weight (C, 1, K) -> stored tap-major (K, C)
        "dw": scale * jax.random.normal(ks[4], (K, C), jnp.float32),
        "bn_g": jnp.ones((1, C), jnp.float32),
        "bn_b": jnp.zeros((1, C), jnp.float32),
        # Conv1d weight (C, C, 1) -> stored transposed (C, C)
        "w2": scale * jax.random.normal(ks[5], (C, C), jnp.float32),
        "b2": scale * jax.random.normal(ks[6], (1, C), jnp.float32),
    }


if __name__ == "__main__":
    key = jax.random.PRNGKey(0)
    k_x, k_p = jax.random.split(key)
    x = jax.random.normal(k_x, (B, T, C), jnp.float32)

    # encoder_padding_mask: True where padded (suffix mask from lengths)
    lengths = jnp.array([T - 3, T - 5], jnp.int32)
    pad_mask = jnp.arange(T)[None, :] >= lengths[:, None]     # (B, T) bool

    params = make_params(k_p)

    out = conformer_conv_module(x, pad_mask, params)
    out = jax.block_until_ready(out)

    ref = reference(x, pad_mask, params)
    assert out.shape == (B, T, C)
    # bf16 MXU operands (f32 accumulation / statistics) -> loosened tolerance.
    assert jnp.allclose(out, ref, rtol=3e-2, atol=3e-2), (
        f"max abs err {jnp.max(jnp.abs(out - ref))}")

    print("KERNEL_OK")
</pallas_src>

<mosaic_0001>
module attributes {stable_mosaic.version = 11 : i64} {
  func.func @conformer_conv_kernel(%arg0: memref<2xi32, #tpu.memory_space<smem>>, %arg1: memref<2x16x128xf32, #tpu.memory_space<vmem>>, %arg2: memref<128x256xbf16, #tpu.memory_space<vmem>>, %arg3: memref<128x128xbf16, #tpu.memory_space<vmem>>, %arg4: memref<36x128xf32, #tpu.memory_space<vmem>>, %arg5: memref<2x16x128xf32, #tpu.memory_space<vmem>>, %arg6: memref<2x48x128xf32, #tpu.memory_space<vmem>>) attributes {dimension_semantics = [], scalar_prefetch = 0 : i64, scratch_operands = 1 : i64, tpu.core_type = #tpu.core_type<tc>} {
    %c0 = arith.constant 0 : index
    %c0_0 = arith.constant 0 : index
    %c0_1 = arith.constant 0 : index
    %0 = vector.load %arg1[%c0, %c0_0, %c0_1] : memref<2x16x128xf32, #tpu.memory_space<vmem>>, vector<2x16x128xf32>
    %1 = tpu.iota {dimensions = array<i32: 1>} : vector<1x16x128xi32>
    %c0_2 = arith.constant 0 : index
    %2 = memref.load %arg0[%c0_2] : memref<2xi32, #tpu.memory_space<smem>>
    %3 = vector.broadcast %2 : i32 to vector<1x16x128xi32>
    %4 = arith.cmpi slt, %1, %3 : vector<1x16x128xi32>
    %5 = arith.extui %4 : vector<1x16x128xi1> to vector<1x16x128xi32>
    %6 = arith.sitofp %5 : vector<1x16x128xi32> to vector<1x16x128xf32>
    %c1 = arith.constant 1 : index
    %7 = memref.load %arg0[%c1] : memref<2xi32, #tpu.memory_space<smem>>
    %8 = vector.broadcast %7 : i32 to vector<1x16x128xi32>
    %9 = arith.cmpi slt, %1, %8 : vector<1x16x128xi32>
    %10 = arith.extui %9 : vector<1x16x128xi1> to vector<1x16x128xi32>
    %11 = arith.sitofp %10 : vector<1x16x128xi32> to vector<1x16x128xf32>
    %12 = tpu.concatenate %6, %11 in 0 : vector<1x16x128xf32>, vector<1x16x128xf32> -> vector<2x16x128xf32>
    %cst = arith.constant dense<0.000000e+00> : vector<2x16xf32>
    %13 = vector.multi_reduction <add>, %0, %cst [2] : vector<2x16x128xf32> to vector<2x16xf32>
    %14 = vector.shape_cast %13 : vector<2x16xf32> to vector<2x16x1xf32>
    %15 = arith.mulf %0, %0 : vector<2x16x128xf32>
    %cst_3 = arith.constant dense<0.000000e+00> : vector<2x16xf32>
    %16 = vector.multi_reduction <add>, %15, %cst_3 [2] : vector<2x16x128xf32> to vector<2x16xf32>
    %17 = vector.shape_cast %16 : vector<2x16xf32> to vector<2x16x1xf32>
    %cst_4 = arith.constant 1.250000e-01 : f32
    %18 = vector.broadcast %cst_4 : f32 to vector<2x16x1xf32>
    %19 = arith.mulf %14, %18 : vector<2x16x1xf32>
    %cst_5 = arith.constant 1.250000e-01 : f32
    %20 = vector.broadcast %cst_5 : f32 to vector<2x16x1xf32>
    %21 = arith.mulf %17, %20 : vector<2x16x1xf32>
    %22 = arith.mulf %19, %19 : vector<2x16x1xf32>
    %23 = arith.subf %21, %22 : vector<2x16x1xf32>
    %cst_6 = arith.constant 0.000000e+00 : f32
    %24 = vector.broadcast %cst_6 : f32 to vector<2x16x1xf32>
    %25 = arith.maximumf %23, %24 : vector<2x16x1xf32>
    %26 = vector.broadcast %19 : vector<2x16x1xf32> to vector<2x16x128xf32>
    %27 = arith.subf %0, %26 : vector<2x16x128xf32>
    %cst_7 = arith.constant 9.99999974E-6 : f32
    %28 = vector.broadcast %cst_7 : f32 to vector<2x16x1xf32>
    %29 = arith.addf %25, %28 : vector<2x16x1xf32>
    %30 = math.rsqrt %29 : vector<2x16x1xf32>
    %31 = vector.broadcast %30 : vector<2x16x1xf32> to vector<2x16x128xf32>
    %32 = arith.mulf %27, %31 : vector<2x16x128xf32>
    %33 = vector.shape_cast %32 : vector<2x16x128xf32> to vector<32x128xf32>
    %34 = arith.truncf %33 : vector<32x128xf32> to vector<32x128xbf16>
    %c0_8 = arith.constant 0 : index
    %c0_9 = arith.constant 0 : index
    %35 = vector.load %arg2[%c0_8, %c0_9] : memref<128x256xbf16, #tpu.memory_space<vmem>>, vector<128x256xbf16>
    %cst_10 = arith.constant dense<0.000000e+00> : vector<32x256xf32>
    %36 = tpu.matmul %34, %35, %cst_10 {dimension_numbers = #tpu.dot_dimension_numbers<[1], [0], [0], [1], [0, 0, 1, 1], [], []>} : vector<32x128xbf16>, vector<128x256xbf16>, vector<32x256xf32> -> vector<32x256xf32>
    %37 = vector.extract_strided_slice %36 {offsets = [0, 0], sizes = [32, 128], strides = [1, 1]} : vector<32x256xf32> to vector<32x128xf32>
    %c31 = arith.constant 31 : index
    %c0_11 = arith.constant 0 : index
    %38 = vector.load %arg4[%c31, %c0_11] : memref<36x128xf32, #tpu.memory_space<vmem>>, vector<1x128xf32>
    %39 = vector.broadcast %38 : vector<1x128xf32> to vector<32x128xf32>
    %40 = arith.addf %37, %39 : vector<32x128xf32>
    %41 = vector.extract_strided_slice %36 {offsets = [0, 128], sizes = [32, 128], strides = [1, 1]} : vector<32x256xf32> to vector<32x128xf32>
    %c32 = arith.constant 32 : index
    %c0_12 = arith.constant 0 : index
    %42 = vector.load %arg4[%c32, %c0_12] : memref<36x128xf32, #tpu.memory_space<vmem>>, vector<1x128xf32>
    %43 = vector.broadcast %42 : vector<1x128xf32> to vector<32x128xf32>
    %44 = arith.addf %41, %43 : vector<32x128xf32>
    %45 = arith.negf %44 : vector<32x128xf32>
    %46 = math.exp %45 : vector<32x128xf32>
    %cst_13 = arith.constant 1.000000e+00 : f32
    %47 = vector.broadcast %cst_13 : f32 to vector<32x128xf32>
    %48 = arith.addf %47, %46 : vector<32x128xf32>
    %49 = arith.divf %47, %48 : vector<32x128xf32>
    %50 = arith.mulf %40, %49 : vector<32x128xf32>
    %51 = vector.shape_cast %50 : vector<32x128xf32> to vector<2x16x128xf32>
    %52 = arith.mulf %51, %12 : vector<2x16x128xf32>
    %cst_14 = arith.constant 0.000000e+00 : f32
    %53 = vector.broadcast %cst_14 : f32 to vector<2x16x128xf32>
    %c0_15 = arith.constant 0 : index
    %c0_16 = arith.constant 0 : index
    %c0_17 = arith.constant 0 : index
    %54 = vector.load %arg6[%c0_15, %c0_16, %c0_17] : memref<2x48x128xf32, #tpu.memory_space<vmem>>, vector<2x16x128xf32>
    tpu.vector_store %arg6[%c0_15, %c0_16, %c0_17], %53 {strides = array<i32>} : memref<2x48x128xf32, #tpu.memory_space<vmem>>, vector<2x16x128xf32>,
    %cst_18 = arith.constant 0.000000e+00 : f32
    %55 = vector.broadcast %cst_18 : f32 to vector<2x16x128xf32>
    %c0_19 = arith.constant 0 : index
    %c32_20 = arith.constant 32 : index
    %c0_21 = arith.constant 0 : index
    %56 = vector.load %arg6[%c0_19, %c32_20, %c0_21] : memref<2x48x128xf32, #tpu.memory_space<vmem>>, vector<2x16x128xf32>
    tpu.vector_store %arg6[%c0_19, %c32_20, %c0_21], %55 {strides = array<i32>} : memref<2x48x128xf32, #tpu.memory_space<vmem>>, vector<2x16x128xf32>,
    %c0_22 = arith.constant 0 : index
    %c16 = arith.constant 16 : index
    %c0_23 = arith.constant 0 : index
    %57 = vector.load %arg6[%c0_22, %c16, %c0_23] : memref<2x48x128xf32, #tpu.memory_space<vmem>>, vector<2x16x128xf32>
    tpu.vector_store %arg6[%c0_22, %c16, %c0_23], %52 {strides = array<i32>} : memref<2x48x128xf32, #tpu.memory_space<vmem>>, vector<2x16x128xf32>,
    %cst_24 = arith.constant 0.000000e+00 : f32
    %58 = vector.broadcast %cst_24 : f32 to vector<2x16x128xf32>
    %c0_i32 = arith.constant 0 : i32
    %59 = arith.index_cast %c0_i32 : i32 to index
    %c0_25 = arith.constant 0 : index
    %60 = vector.load %arg4[%59, %c0_25] : memref<36x128xf32, #tpu.memory_space<vmem>>, vector<1x128xf32>
    %c1_i32 = arith.constant 1 : i32
    %61 = arith.addi %c1_i32, %c0_i32 : i32
    %c0_26 = arith.constant 0 : index
    %62 = arith.index_cast %61 : i32 to index
    %c0_27 = arith.constant 0 : index
    %63 = vector.load %arg6[%c0_26, %62, %c0_27] : memref<2x48x128xf32, #tpu.memory_space<vmem>>, vector<2x16x128xf32>
    %64 = vector.shape_cast %60 : vector<1x128xf32> to vector<1x1x128xf32>
    %65 = vector.broadcast %64 : vector<1x1x128xf32> to vector<2x16x128xf32>
    %66 = arith.mulf %63, %65 : vector<2x16x128xf32>
    %67 = arith.addf %58, %66 : vector<2x16x128xf32>
    %c1_i32_28 = arith.constant 1 : i32
    %68 = arith.index_cast %c1_i32_28 : i32 to index
    %c0_29 = arith.constant 0 : index
    %69 = vector.load %arg4[%68, %c0_29] : memref<36x128xf32, #tpu.memory_space<vmem>>, vector<1x128xf32>
    %c1_i32_30 = arith.constant 1 : i32
    %70 = arith.addi %c1_i32_30, %c1_i32_28 : i32
    %c0_31 = arith.constant 0 : index
    %71 = arith.index_cast %70 : i32 to index
    %c0_32 = arith.constant 0 : index
    %72 = vector.load %arg6[%c0_31, %71, %c0_32] : memref<2x48x128xf32, #tpu.memory_space<vmem>>, vector<2x16x128xf32>
    %73 = vector.shape_cast %69 : vector<1x128xf32> to vector<1x1x128xf32>
    %74 = vector.broadcast %73 : vector<1x1x128xf32> to vector<2x16x128xf32>
    %75 = arith.mulf %72, %74 : vector<2x16x128xf32>
    %76 = arith.addf %67, %75 : vector<2x16x128xf32>
    %c2_i32 = arith.constant 2 : i32
    %77 = arith.index_cast %c2_i32 : i32 to index
    %c0_33 = arith.constant 0 : index
    %78 = vector.load %arg4[%77, %c0_33] : memref<36x128xf32, #tpu.memory_space<vmem>>, vector<1x128xf32>
    %c1_i32_34 = arith.constant 1 : i32
    %79 = arith.addi %c1_i32_34, %c2_i32 : i32
    %c0_35 = arith.constant 0 : index
    %80 = arith.index_cast %79 : i32 to index
    %c0_36 = arith.constant 0 : index
    %81 = vector.load %arg6[%c0_35, %80, %c0_36] : memref<2x48x128xf32, #tpu.memory_space<vmem>>, vector<2x16x128xf32>
    %82 = vector.shape_cast %78 : vector<1x128xf32> to vector<1x1x128xf32>
    %83 = vector.broadcast %82 : vector<1x1x128xf32> to vector<2x16x128xf32>
    %84 = arith.mulf %81, %83 : vector<2x16x128xf32>
    %85 = arith.addf %76, %84 : vector<2x16x128xf32>
    %c3_i32 = arith.constant 3 : i32
    %86 = arith.index_cast %c3_i32 : i32 to index
    %c0_37 = arith.constant 0 : index
    %87 = vector.load %arg4[%86, %c0_37] : memref<36x128xf32, #tpu.memory_space<vmem>>, vector<1x128xf32>
    %c1_i32_38 = arith.constant 1 : i32
    %88 = arith.addi %c1_i32_38, %c3_i32 : i32
    %c0_39 = arith.constant 0 : index
    %89 = arith.index_cast %88 : i32 to index
    %c0_40 = arith.constant 0 : index
    %90 = vector.load %arg6[%c0_39, %89, %c0_40] : memref<2x48x128xf32, #tpu.memory_space<vmem>>, vector<2x16x128xf32>
    %91 = vector.shape_cast %87 : vector<1x128xf32> to vector<1x1x128xf32>
    %92 = vector.broadcast %91 : vector<1x1x128xf32> to vector<2x16x128xf32>
    %93 = arith.mulf %90, %92 : vector<2x16x128xf32>
    %94 = arith.addf %85, %93 : vector<2x16x128xf32>
    %c4_i32 = arith.constant 4 : i32
    %95 = arith.index_cast %c4_i32 : i32 to index
    %c0_41 = arith.constant 0 : index
    %96 = vector.load %arg4[%95, %c0_41] : memref<36x128xf32, #tpu.memory_space<vmem>>, vector<1x128xf32>
    %c1_i32_42 = arith.constant 1 : i32
    %97 = arith.addi %c1_i32_42, %c4_i32 : i32
    %c0_43 = arith.constant 0 : index
    %98 = arith.index_cast %97 : i32 to index
    %c0_44 = arith.constant 0 : index
    %99 = vector.load %arg6[%c0_43, %98, %c0_44] : memref<2x48x128xf32, #tpu.memory_space<vmem>>, vector<2x16x128xf32>
    %100 = vector.shape_cast %96 : vector<1x128xf32> to vector<1x1x128xf32>
    %101 = vector.broadcast %100 : vector<1x1x128xf32> to vector<2x16x128xf32>
    %102 = arith.mulf %99, %101 : vector<2x16x128xf32>
    %103 = arith.addf %94, %102 : vector<2x16x128xf32>
    %c5_i32 = arith.constant 5 : i32
    %104 = arith.index_cast %c5_i32 : i32 to index
    %c0_45 = arith.constant 0 : index
    %105 = vector.load %arg4[%104, %c0_45] : memref<36x128xf32, #tpu.memory_space<vmem>>, vector<1x128xf32>
    %c1_i32_46 = arith.constant 1 : i32
    %106 = arith.addi %c1_i32_46, %c5_i32 : i32
    %c0_47 = arith.constant 0 : index
    %107 = arith.index_cast %106 : i32 to index
    %c0_48 = arith.constant 0 : index
    %108 = vector.load %arg6[%c0_47, %107, %c0_48] : memref<2x48x128xf32, #tpu.memory_space<vmem>>, vector<2x16x128xf32>
    %109 = vector.shape_cast %105 : vector<1x128xf32> to vector<1x1x128xf32>
    %110 = vector.broadcast %109 : vector<1x1x128xf32> to vector<2x16x128xf32>
    %111 = arith.mulf %108, %110 : vector<2x16x128xf32>
    %112 = arith.addf %103, %111 : vector<2x16x128xf32>
    %c6_i32 = arith.constant 6 : i32
    %113 = arith.index_cast %c6_i32 : i32 to index
    %c0_49 = arith.constant 0 : index
    %114 = vector.load %arg4[%113, %c0_49] : memref<36x128xf32, #tpu.memory_space<vmem>>, vector<1x128xf32>
    %c1_i32_50 = arith.constant 1 : i32
    %115 = arith.addi %c1_i32_50, %c6_i32 : i32
    %c0_51 = arith.constant 0 : index
    %116 = arith.index_cast %115 : i32 to index
    %c0_52 = arith.constant 0 : index
    %117 = vector.load %arg6[%c0_51, %116, %c0_52] : memref<2x48x128xf32, #tpu.memory_space<vmem>>, vector<2x16x128xf32>
    %118 = vector.shape_cast %114 : vector<1x128xf32> to vector<1x1x128xf32>
    %119 = vector.broadcast %118 : vector<1x1x128xf32> to vector<2x16x128xf32>
    %120 = arith.mulf %117, %119 : vector<2x16x128xf32>
    %121 = arith.addf %112, %120 : vector<2x16x128xf32>
    %c7_i32 = arith.constant 7 : i32
    %122 = arith.index_cast %c7_i32 : i32 to index
    %c0_53 = arith.constant 0 : index
    %123 = vector.load %arg4[%122, %c0_53] : memref<36x128xf32, #tpu.memory_space<vmem>>, vector<1x128xf32>
    %c1_i32_54 = arith.constant 1 : i32
    %124 = arith.addi %c1_i32_54, %c7_i32 : i32
    %c0_55 = arith.constant 0 : index
    %125 = arith.index_cast %124 : i32 to index
    %c0_56 = arith.constant 0 : index
    %126 = vector.load %arg6[%c0_55, %125, %c0_56] : memref<2x48x128xf32, #tpu.memory_space<vmem>>, vector<2x16x128xf32>
    %127 = vector.shape_cast %123 : vector<1x128xf32> to vector<1x1x128xf32>
    %128 = vector.broadcast %127 : vector<1x1x128xf32> to vector<2x16x128xf32>
    %129 = arith.mulf %126, %128 : vector<2x16x128xf32>
    %130 = arith.addf %121, %129 : vector<2x16x128xf32>
    %c8_i32 = arith.constant 8 : i32
    %131 = arith.index_cast %c8_i32 : i32 to index
    %c0_57 = arith.constant 0 : index
    %132 = vector.load %arg4[%131, %c0_57] : memref<36x128xf32, #tpu.memory_space<vmem>>, vector<1x128xf32>
    %c1_i32_58 = arith.constant 1 : i32
    %133 = arith.addi %c1_i32_58, %c8_i32 : i32
    %c0_59 = arith.constant 0 : index
    %134 = arith.index_cast %133 : i32 to index
    %c0_60 = arith.constant 0 : index
    %135 = vector.load %arg6[%c0_59, %134, %c0_60] : memref<2x48x128xf32, #tpu.memory_space<vmem>>, vector<2x16x128xf32>
    %136 = vector.shape_cast %132 : vector<1x128xf32> to vector<1x1x128xf32>
    %137 = vector.broadcast %136 : vector<1x1x128xf32> to vector<2x16x128xf32>
    %138 = arith.mulf %135, %137 : vector<2x16x128xf32>
    %139 = arith.addf %130, %138 : vector<2x16x128xf32>
    %c9_i32 = arith.constant 9 : i32
    %140 = arith.index_cast %c9_i32 : i32 to index
    %c0_61 = arith.constant 0 : index
    %141 = vector.load %arg4[%140, %c0_61] : memref<36x128xf32, #tpu.memory_space<vmem>>, vector<1x128xf32>
    %c1_i32_62 = arith.constant 1 : i32
    %142 = arith.addi %c1_i32_62, %c9_i32 : i32
    %c0_63 = arith.constant 0 : index
    %143 = arith.index_cast %142 : i32 to index
    %c0_64 = arith.constant 0 : index
    %144 = vector.load %arg6[%c0_63, %143, %c0_64] : memref<2x48x128xf32, #tpu.memory_space<vmem>>, vector<2x16x128xf32>
    %145 = vector.shape_cast %141 : vector<1x128xf32> to vector<1x1x128xf32>
    %146 = vector.broadcast %145 : vector<1x1x128xf32> to vector<2x16x128xf32>
    %147 = arith.mulf %144, %146 : vector<2x16x128xf32>
    %148 = arith.addf %139, %147 : vector<2x16x128xf32>
    %c10_i32 = arith.constant 10 : i32
    %149 = arith.index_cast %c10_i32 : i32 to index
    %c0_65 = arith.constant 0 : index
    %150 = vector.load %arg4[%149, %c0_65] : memref<36x128xf32, #tpu.memory_space<vmem>>, vector<1x128xf32>
    %c1_i32_66 = arith.constant 1 : i32
    %151 = arith.addi %c1_i32_66, %c10_i32 : i32
    %c0_67 = arith.constant 0 : index
    %152 = arith.index_cast %151 : i32 to index
    %c0_68 = arith.constant 0 : index
    %153 = vector.load %arg6[%c0_67, %152, %c0_68] : memref<2x48x128xf32, #tpu.memory_space<vmem>>, vector<2x16x128xf32>
    %154 = vector.shape_cast %150 : vector<1x128xf32> to vector<1x1x128xf32>
    %155 = vector.broadcast %154 : vector<1x1x128xf32> to vector<2x16x128xf32>
    %156 = arith.mulf %153, %155 : vector<2x16x128xf32>
    %157 = arith.addf %148, %156 : vector<2x16x128xf32>
    %c11_i32 = arith.constant 11 : i32
    %158 = arith.index_cast %c11_i32 : i32 to index
    %c0_69 = arith.constant 0 : index
    %159 = vector.load %arg4[%158, %c0_69] : memref<36x128xf32, #tpu.memory_space<vmem>>, vector<1x128xf32>
    %c1_i32_70 = arith.constant 1 : i32
    %160 = arith.addi %c1_i32_70, %c11_i32 : i32
    %c0_71 = arith.constant 0 : index
    %161 = arith.index_cast %160 : i32 to index
    %c0_72 = arith.constant 0 : index
    %162 = vector.load %arg6[%c0_71, %161, %c0_72] : memref<2x48x128xf32, #tpu.memory_space<vmem>>, vector<2x16x128xf32>
    %163 = vector.shape_cast %159 : vector<1x128xf32> to vector<1x1x128xf32>
    %164 = vector.broadcast %163 : vector<1x1x128xf32> to vector<2x16x128xf32>
    %165 = arith.mulf %162, %164 : vector<2x16x128xf32>
    %166 = arith.addf %157, %165 : vector<2x16x128xf32>
    %c12_i32 = arith.constant 12 : i32
    %167 = arith.index_cast %c12_i32 : i32 to index
    %c0_73 = arith.constant 0 : index
    %168 = vector.load %arg4[%167, %c0_73] : memref<36x128xf32, #tpu.memory_space<vmem>>, vector<1x128xf32>
    %c1_i32_74 = arith.constant 1 : i32
    %169 = arith.addi %c1_i32_74, %c12_i32 : i32
    %c0_75 = arith.constant 0 : index
    %170 = arith.index_cast %169 : i32 to index
    %c0_76 = arith.constant 0 : index
    %171 = vector.load %arg6[%c0_75, %170, %c0_76] : memref<2x48x128xf32, #tpu.memory_space<vmem>>, vector<2x16x128xf32>
    %172 = vector.shape_cast %168 : vector<1x128xf32> to vector<1x1x128xf32>
    %173 = vector.broadcast %172 : vector<1x1x128xf32> to vector<2x16x128xf32>
    %174 = arith.mulf %171, %173 : vector<2x16x128xf32>
    %175 = arith.addf %166, %174 : vector<2x16x128xf32>
    %c13_i32 = arith.constant 13 : i32
    %176 = arith.index_cast %c13_i32 : i32 to index
    %c0_77 = arith.constant 0 : index
    %177 = vector.load %arg4[%176, %c0_77] : memref<36x128xf32, #tpu.memory_space<vmem>>, vector<1x128xf32>
    %c1_i32_78 = arith.constant 1 : i32
    %178 = arith.addi %c1_i32_78, %c13_i32 : i32
    %c0_79 = arith.constant 0 : index
    %179 = arith.index_cast %178 : i32 to index
    %c0_80 = arith.constant 0 : index
    %180 = vector.load %arg6[%c0_79, %179, %c0_80] : memref<2x48x128xf32, #tpu.memory_space<vmem>>, vector<2x16x128xf32>
    %181 = vector.shape_cast %177 : vector<1x128xf32> to vector<1x1x128xf32>
    %182 = vector.broadcast %181 : vector<1x1x128xf32> to vector<2x16x128xf32>
    %183 = arith.mulf %180, %182 : vector<2x16x128xf32>
    %184 = arith.addf %175, %183 : vector<2x16x128xf32>
    %c14_i32 = arith.constant 14 : i32
    %185 = arith.index_cast %c14_i32 : i32 to index
    %c0_81 = arith.constant 0 : index
    %186 = vector.load %arg4[%185, %c0_81] : memref<36x128xf32, #tpu.memory_space<vmem>>, vector<1x128xf32>
    %c1_i32_82 = arith.constant 1 : i32
    %187 = arith.addi %c1_i32_82, %c14_i32 : i32
    %c0_83 = arith.constant 0 : index
    %188 = arith.index_cast %187 : i32 to index
    %c0_84 = arith.constant 0 : index
    %189 = vector.load %arg6[%c0_83, %188, %c0_84] : memref<2x48x128xf32, #tpu.memory_space<vmem>>, vector<2x16x128xf32>
    %190 = vector.shape_cast %186 : vector<1x128xf32> to vector<1x1x128xf32>
    %191 = vector.broadcast %190 : vector<1x1x128xf32> to vector<2x16x128xf32>
    %192 = arith.mulf %189, %191 : vector<2x16x128xf32>
    %193 = arith.addf %184, %192 : vector<2x16x128xf32>
    %c15_i32 = arith.constant 15 : i32
    %194 = arith.index_cast %c15_i32 : i32 to index
    %c0_85 = arith.constant 0 : index
    %195 = vector.load %arg4[%194, %c0_85] : memref<36x128xf32, #tpu.memory_space<vmem>>, vector<1x128xf32>
    %c1_i32_86 = arith.constant 1 : i32
    %196 = arith.addi %c1_i32_86, %c15_i32 : i32
    %c0_87 = arith.constant 0 : index
    %197 = arith.index_cast %196 : i32 to index
    %c0_88 = arith.constant 0 : index
    %198 = vector.load %arg6[%c0_87, %197, %c0_88] : memref<2x48x128xf32, #tpu.memory_space<vmem>>, vector<2x16x128xf32>
    %199 = vector.shape_cast %195 : vector<1x128xf32> to vector<1x1x128xf32>
    %200 = vector.broadcast %199 : vector<1x1x128xf32> to vector<2x16x128xf32>
    %201 = arith.mulf %198, %200 : vector<2x16x128xf32>
    %202 = arith.addf %193, %201 : vector<2x16x128xf32>
    %c16_i32 = arith.constant 16 : i32
    %203 = arith.index_cast %c16_i32 : i32 to index
    %c0_89 = arith.constant 0 : index
    %204 = vector.load %arg4[%203, %c0_89] : memref<36x128xf32, #tpu.memory_space<vmem>>, vector<1x128xf32>
    %c1_i32_90 = arith.constant 1 : i32
    %205 = arith.addi %c1_i32_90, %c16_i32 : i32
    %c0_91 = arith.constant 0 : index
    %206 = arith.index_cast %205 : i32 to index
    %c0_92 = arith.constant 0 : index
    %207 = vector.load %arg6[%c0_91, %206, %c0_92] : memref<2x48x128xf32, #tpu.memory_space<vmem>>, vector<2x16x128xf32>
    %208 = vector.shape_cast %204 : vector<1x128xf32> to vector<1x1x128xf32>
    %209 = vector.broadcast %208 : vector<1x1x128xf32> to vector<2x16x128xf32>
    %210 = arith.mulf %207, %209 : vector<2x16x128xf32>
    %211 = arith.addf %202, %210 : vector<2x16x128xf32>
    %c17_i32 = arith.constant 17 : i32
    %212 = arith.index_cast %c17_i32 : i32 to index
    %c0_93 = arith.constant 0 : index
    %213 = vector.load %arg4[%212, %c0_93] : memref<36x128xf32, #tpu.memory_space<vmem>>, vector<1x128xf32>
    %c1_i32_94 = arith.constant 1 : i32
    %214 = arith.addi %c1_i32_94, %c17_i32 : i32
    %c0_95 = arith.constant 0 : index
    %215 = arith.index_cast %214 : i32 to index
    %c0_96 = arith.constant 0 : index
    %216 = vector.load %arg6[%c0_95, %215, %c0_96] : memref<2x48x128xf32, #tpu.memory_space<vmem>>, vector<2x16x128xf32>
    %217 = vector.shape_cast %213 : vector<1x128xf32> to vector<1x1x128xf32>
    %218 = vector.broadcast %217 : vector<1x1x128xf32> to vector<2x16x128xf32>
    %219 = arith.mulf %216, %218 : vector<2x16x128xf32>
    %220 = arith.addf %211, %219 : vector<2x16x128xf32>
    %c18_i32 = arith.constant 18 : i32
    %221 = arith.index_cast %c18_i32 : i32 to index
    %c0_97 = arith.constant 0 : index
    %222 = vector.load %arg4[%221, %c0_97] : memref<36x128xf32, #tpu.memory_space<vmem>>, vector<1x128xf32>
    %c1_i32_98 = arith.constant 1 : i32
    %223 = arith.addi %c1_i32_98, %c18_i32 : i32
    %c0_99 = arith.constant 0 : index
    %224 = arith.index_cast %223 : i32 to index
    %c0_100 = arith.constant 0 : index
    %225 = vector.load %arg6[%c0_99, %224, %c0_100] : memref<2x48x128xf32, #tpu.memory_space<vmem>>, vector<2x16x128xf32>
    %226 = vector.shape_cast %222 : vector<1x128xf32> to vector<1x1x128xf32>
    %227 = vector.broadcast %226 : vector<1x1x128xf32> to vector<2x16x128xf32>
    %228 = arith.mulf %225, %227 : vector<2x16x128xf32>
    %229 = arith.addf %220, %228 : vector<2x16x128xf32>
    %c19_i32 = arith.constant 19 : i32
    %230 = arith.index_cast %c19_i32 : i32 to index
    %c0_101 = arith.constant 0 : index
    %231 = vector.load %arg4[%230, %c0_101] : memref<36x128xf32, #tpu.memory_space<vmem>>, vector<1x128xf32>
    %c1_i32_102 = arith.constant 1 : i32
    %232 = arith.addi %c1_i32_102, %c19_i32 : i32
    %c0_103 = arith.constant 0 : index
    %233 = arith.index_cast %232 : i32 to index
    %c0_104 = arith.constant 0 : index
    %234 = vector.load %arg6[%c0_103, %233, %c0_104] : memref<2x48x128xf32, #tpu.memory_space<vmem>>, vector<2x16x128xf32>
    %235 = vector.shape_cast %231 : vector<1x128xf32> to vector<1x1x128xf32>
    %236 = vector.broadcast %235 : vector<1x1x128xf32> to vector<2x16x128xf32>
    %237 = arith.mulf %234, %236 : vector<2x16x128xf32>
    %238 = arith.addf %229, %237 : vector<2x16x128xf32>
    %c20_i32 = arith.constant 20 : i32
    %239 = arith.index_cast %c20_i32 : i32 to index
    %c0_105 = arith.constant 0 : index
    %240 = vector.load %arg4[%239, %c0_105] : memref<36x128xf32, #tpu.memory_space<vmem>>, vector<1x128xf32>
    %c1_i32_106 = arith.constant 1 : i32
    %241 = arith.addi %c1_i32_106, %c20_i32 : i32
    %c0_107 = arith.constant 0 : index
    %242 = arith.index_cast %241 : i32 to index
    %c0_108 = arith.constant 0 : index
    %243 = vector.load %arg6[%c0_107, %242, %c0_108] : memref<2x48x128xf32, #tpu.memory_space<vmem>>, vector<2x16x128xf32>
    %244 = vector.shape_cast %240 : vector<1x128xf32> to vector<1x1x128xf32>
    %245 = vector.broadcast %244 : vector<1x1x128xf32> to vector<2x16x128xf32>
    %246 = arith.mulf %243, %245 : vector<2x16x128xf32>
    %247 = arith.addf %238, %246 : vector<2x16x128xf32>
    %c21_i32 = arith.constant 21 : i32
    %248 = arith.index_cast %c21_i32 : i32 to index
    %c0_109 = arith.constant 0 : index
    %249 = vector.load %arg4[%248, %c0_109] : memref<36x128xf32, #tpu.memory_space<vmem>>, vector<1x128xf32>
    %c1_i32_110 = arith.constant 1 : i32
    %250 = arith.addi %c1_i32_110, %c21_i32 : i32
    %c0_111 = arith.constant 0 : index
    %251 = arith.index_cast %250 : i32 to index
    %c0_112 = arith.constant 0 : index
    %252 = vector.load %arg6[%c0_111, %251, %c0_112] : memref<2x48x128xf32, #tpu.memory_space<vmem>>, vector<2x16x128xf32>
    %253 = vector.shape_cast %249 : vector<1x128xf32> to vector<1x1x128xf32>
    %254 = vector.broadcast %253 : vector<1x1x128xf32> to vector<2x16x128xf32>
    %255 = arith.mulf %252, %254 : vector<2x16x128xf32>
    %256 = arith.addf %247, %255 : vector<2x16x128xf32>
    %c22_i32 = arith.constant 22 : i32
    %257 = arith.index_cast %c22_i32 : i32 to index
    %c0_113 = arith.constant 0 : index
    %258 = vector.load %arg4[%257, %c0_113] : memref<36x128xf32, #tpu.memory_space<vmem>>, vector<1x128xf32>
    %c1_i32_114 = arith.constant 1 : i32
    %259 = arith.addi %c1_i32_114, %c22_i32 : i32
    %c0_115 = arith.constant 0 : index
    %260 = arith.index_cast %259 : i32 to index
    %c0_116 = arith.constant 0 : index
    %261 = vector.load %arg6[%c0_115, %260, %c0_116] : memref<2x48x128xf32, #tpu.memory_space<vmem>>, vector<2x16x128xf32>
    %262 = vector.shape_cast %258 : vector<1x128xf32> to vector<1x1x128xf32>
    %263 = vector.broadcast %262 : vector<1x1x128xf32> to vector<2x16x128xf32>
    %264 = arith.mulf %261, %263 : vector<2x16x128xf32>
    %265 = arith.addf %256, %264 : vector<2x16x128xf32>
    %c23_i32 = arith.constant 23 : i32
    %266 = arith.index_cast %c23_i32 : i32 to index
    %c0_117 = arith.constant 0 : index
    %267 = vector.load %arg4[%266, %c0_117] : memref<36x128xf32, #tpu.memory_space<vmem>>, vector<1x128xf32>
    %c1_i32_118 = arith.constant 1 : i32
    %268 = arith.addi %c1_i32_118, %c23_i32 : i32
    %c0_119 = arith.constant 0 : index
    %269 = arith.index_cast %268 : i32 to index
    %c0_120 = arith.constant 0 : index
    %270 = vector.load %arg6[%c0_119, %269, %c0_120] : memref<2x48x128xf32, #tpu.memory_space<vmem>>, vector<2x16x128xf32>
    %271 = vector.shape_cast %267 : vector<1x128xf32> to vector<1x1x128xf32>
    %272 = vector.broadcast %271 : vector<1x1x128xf32> to vector<2x16x128xf32>
    %273 = arith.mulf %270, %272 : vector<2x16x128xf32>
    %274 = arith.addf %265, %273 : vector<2x16x128xf32>
    %c24_i32 = arith.constant 24 : i32
    %275 = arith.index_cast %c24_i32 : i32 to index
    %c0_121 = arith.constant 0 : index
    %276 = vector.load %arg4[%275, %c0_121] : memref<36x128xf32, #tpu.memory_space<vmem>>, vector<1x128xf32>
    %c1_i32_122 = arith.constant 1 : i32
    %277 = arith.addi %c1_i32_122, %c24_i32 : i32
    %c0_123 = arith.constant 0 : index
    %278 = arith.index_cast %277 : i32 to index
    %c0_124 = arith.constant 0 : index
    %279 = vector.load %arg6[%c0_123, %278, %c0_124] : memref<2x48x128xf32, #tpu.memory_space<vmem>>, vector<2x16x128xf32>
    %280 = vector.shape_cast %276 : vector<1x128xf32> to vector<1x1x128xf32>
    %281 = vector.broadcast %280 : vector<1x1x128xf32> to vector<2x16x128xf32>
    %282 = arith.mulf %279, %281 : vector<2x16x128xf32>
    %283 = arith.addf %274, %282 : vector<2x16x128xf32>
    %c25_i32 = arith.constant 25 : i32
    %284 = arith.index_cast %c25_i32 : i32 to index
    %c0_125 = arith.constant 0 : index
    %285 = vector.load %arg4[%284, %c0_125] : memref<36x128xf32, #tpu.memory_space<vmem>>, vector<1x128xf32>
    %c1_i32_126 = arith.constant 1 : i32
    %286 = arith.addi %c1_i32_126, %c25_i32 : i32
    %c0_127 = arith.constant 0 : index
    %287 = arith.index_cast %286 : i32 to index
    %c0_128 = arith.constant 0 : index
    %288 = vector.load %arg6[%c0_127, %287, %c0_128] : memref<2x48x128xf32, #tpu.memory_space<vmem>>, vector<2x16x128xf32>
    %289 = vector.shape_cast %285 : vector<1x128xf32> to vector<1x1x128xf32>
    %290 = vector.broadcast %289 : vector<1x1x128xf32> to vector<2x16x128xf32>
    %291 = arith.mulf %288, %290 : vector<2x16x128xf32>
    %292 = arith.addf %283, %291 : vector<2x16x128xf32>
    %c26_i32 = arith.constant 26 : i32
    %293 = arith.index_cast %c26_i32 : i32 to index
    %c0_129 = arith.constant 0 : index
    %294 = vector.load %arg4[%293, %c0_129] : memref<36x128xf32, #tpu.memory_space<vmem>>, vector<1x128xf32>
    %c1_i32_130 = arith.constant 1 : i32
    %295 = arith.addi %c1_i32_130, %c26_i32 : i32
    %c0_131 = arith.constant 0 : index
    %296 = arith.index_cast %295 : i32 to index
    %c0_132 = arith.constant 0 : index
    %297 = vector.load %arg6[%c0_131, %296, %c0_132] : memref<2x48x128xf32, #tpu.memory_space<vmem>>, vector<2x16x128xf32>
    %298 = vector.shape_cast %294 : vector<1x128xf32> to vector<1x1x128xf32>
    %299 = vector.broadcast %298 : vector<1x1x128xf32> to vector<2x16x128xf32>
    %300 = arith.mulf %297, %299 : vector<2x16x128xf32>
    %301 = arith.addf %292, %300 : vector<2x16x128xf32>
    %c27_i32 = arith.constant 27 : i32
    %302 = arith.index_cast %c27_i32 : i32 to index
    %c0_133 = arith.constant 0 : index
    %303 = vector.load %arg4[%302, %c0_133] : memref<36x128xf32, #tpu.memory_space<vmem>>, vector<1x128xf32>
    %c1_i32_134 = arith.constant 1 : i32
    %304 = arith.addi %c1_i32_134, %c27_i32 : i32
    %c0_135 = arith.constant 0 : index
    %305 = arith.index_cast %304 : i32 to index
    %c0_136 = arith.constant 0 : index
    %306 = vector.load %arg6[%c0_135, %305, %c0_136] : memref<2x48x128xf32, #tpu.memory_space<vmem>>, vector<2x16x128xf32>
    %307 = vector.shape_cast %303 : vector<1x128xf32> to vector<1x1x128xf32>
    %308 = vector.broadcast %307 : vector<1x1x128xf32> to vector<2x16x128xf32>
    %309 = arith.mulf %306, %308 : vector<2x16x128xf32>
    %310 = arith.addf %301, %309 : vector<2x16x128xf32>
    %c28_i32 = arith.constant 28 : i32
    %311 = arith.index_cast %c28_i32 : i32 to index
    %c0_137 = arith.constant 0 : index
    %312 = vector.load %arg4[%311, %c0_137] : memref<36x128xf32, #tpu.memory_space<vmem>>, vector<1x128xf32>
    %c1_i32_138 = arith.constant 1 : i32
    %313 = arith.addi %c1_i32_138, %c28_i32 : i32
    %c0_139 = arith.constant 0 : index
    %314 = arith.index_cast %313 : i32 to index
    %c0_140 = arith.constant 0 : index
    %315 = vector.load %arg6[%c0_139, %314, %c0_140] : memref<2x48x128xf32, #tpu.memory_space<vmem>>, vector<2x16x128xf32>
    %316 = vector.shape_cast %312 : vector<1x128xf32> to vector<1x1x128xf32>
    %317 = vector.broadcast %316 : vector<1x1x128xf32> to vector<2x16x128xf32>
    %318 = arith.mulf %315, %317 : vector<2x16x128xf32>
    %319 = arith.addf %310, %318 : vector<2x16x128xf32>
    %c29_i32 = arith.constant 29 : i32
    %320 = arith.index_cast %c29_i32 : i32 to index
    %c0_141 = arith.constant 0 : index
    %321 = vector.load %arg4[%320, %c0_141] : memref<36x128xf32, #tpu.memory_space<vmem>>, vector<1x128xf32>
    %c1_i32_142 = arith.constant 1 : i32
    %322 = arith.addi %c1_i32_142, %c29_i32 : i32
    %c0_143 = arith.constant 0 : index
    %323 = arith.index_cast %322 : i32 to index
    %c0_144 = arith.constant 0 : index
    %324 = vector.load %arg6[%c0_143, %323, %c0_144] : memref<2x48x128xf32, #tpu.memory_space<vmem>>, vector<2x16x128xf32>
    %325 = vector.shape_cast %321 : vector<1x128xf32> to vector<1x1x128xf32>
    %326 = vector.broadcast %325 : vector<1x1x128xf32> to vector<2x16x128xf32>
    %327 = arith.mulf %324, %326 : vector<2x16x128xf32>
    %328 = arith.addf %319, %327 : vector<2x16x128xf32>
    %c30_i32 = arith.constant 30 : i32
    %329 = arith.index_cast %c30_i32 : i32 to index
    %c0_145 = arith.constant 0 : index
    %330 = vector.load %arg4[%329, %c0_145] : memref<36x128xf32, #tpu.memory_space<vmem>>, vector<1x128xf32>
    %c1_i32_146 = arith.constant 1 : i32
    %331 = arith.addi %c1_i32_146, %c30_i32 : i32
    %c0_147 = arith.constant 0 : index
    %332 = arith.index_cast %331 : i32 to index
    %c0_148 = arith.constant 0 : index
    %333 = vector.load %arg6[%c0_147, %332, %c0_148] : memref<2x48x128xf32, #tpu.memory_space<vmem>>, vector<2x16x128xf32>
    %334 = vector.shape_cast %330 : vector<1x128xf32> to vector<1x1x128xf32>
    %335 = vector.broadcast %334 : vector<1x1x128xf32> to vector<2x16x128xf32>
    %336 = arith.mulf %333, %335 : vector<2x16x128xf32>
    %337 = arith.addf %328, %336 : vector<2x16x128xf32>
    %c31_i32 = arith.constant 31 : i32
    %338 = arith.mulf %337, %12 : vector<2x16x128xf32>
    %cst_149 = arith.constant dense<0.000000e+00> : vector<128xf32>
    %339 = vector.multi_reduction <add>, %338, %cst_149 [0, 1] : vector<2x16x128xf32> to vector<128xf32>
    %340 = vector.shape_cast %339 : vector<128xf32> to vector<1x1x128xf32>
    %341 = arith.mulf %338, %338 : vector<2x16x128xf32>
    %cst_150 = arith.constant dense<0.000000e+00> : vector<128xf32>
    %342 = vector.multi_reduction <add>, %341, %cst_150 [0, 1] : vector<2x16x128xf32> to vector<128xf32>
    %343 = vector.shape_cast %342 : vector<128xf32> to vector<1x1x128xf32>
    %cst_151 = arith.constant 3.125000e-02 : f32
    %344 = vector.broadcast %cst_151 : f32 to vector<1x1x128xf32>
    %345 = arith.mulf %340, %344 : vector<1x1x128xf32>
    %cst_152 = arith.constant 3.125000e-02 : f32
    %346 = vector.broadcast %cst_152 : f32 to vector<1x1x128xf32>
    %347 = arith.mulf %343, %346 : vector<1x1x128xf32>
    %348 = arith.mulf %345, %345 : vector<1x1x128xf32>
    %349 = arith.subf %347, %348 : vector<1x1x128xf32>
    %cst_153 = arith.constant 0.000000e+00 : f32
    %350 = vector.broadcast %cst_153 : f32 to vector<1x1x128xf32>
    %351 = arith.maximumf %349, %350 : vector<1x1x128xf32>
    %352 = vector.broadcast %345 : vector<1x1x128xf32> to vector<2x16x128xf32>
    %353 = arith.subf %338, %352 : vector<2x16x128xf32>
    %cst_154 = arith.constant 9.99999974E-6 : f32
    %354 = vector.broadcast %cst_154 : f32 to vector<1x1x128xf32>
    %355 = arith.addf %351, %354 : vector<1x1x128xf32>
    %356 = math.rsqrt %355 : vector<1x1x128xf32>
    %357 = vector.broadcast %356 : vector<1x1x128xf32> to vector<2x16x128xf32>
    %358 = arith.mulf %353, %357 : vector<2x16x128xf32>
    %c33 = arith.constant 33 : index
    %c0_155 = arith.constant 0 : index
    %359 = vector.load %arg4[%c33, %c0_155] : memref<36x128xf32, #tpu.memory_space<vmem>>, vector<1x128xf32>
    %360 = vector.shape_cast %359 : vector<1x128xf32> to vector<1x1x128xf32>
    %361 = vector.broadcast %360 : vector<1x1x128xf32> to vector<2x16x128xf32>
    %362 = arith.mulf %358, %361 : vector<2x16x128xf32>
    %c34 = arith.constant 34 : index
    %c0_156 = arith.constant 0 : index
    %363 = vector.load %arg4[%c34, %c0_156] : memref<36x128xf32, #tpu.memory_space<vmem>>, vector<1x128xf32>
    %364 = vector.shape_cast %363 : vector<1x128xf32> to vector<1x1x128xf32>
    %365 = vector.broadcast %364 : vector<1x1x128xf32> to vector<2x16x128xf32>
    %366 = arith.addf %362, %365 : vector<2x16x128xf32>
    %367 = arith.negf %366 : vector<2x16x128xf32>
    %368 = math.exp %367 : vector<2x16x128xf32>
    %cst_157 = arith.constant 1.000000e+00 : f32
    %369 = vector.broadcast %cst_157 : f32 to vector<2x16x128xf32>
    %370 = arith.addf %369, %368 : vector<2x16x128xf32>
    %371 = arith.divf %369, %370 : vector<2x16x128xf32>
    %372 = arith.mulf %366, %371 : vector<2x16x128xf32>
    %373 = vector.shape_cast %372 : vector<2x16x128xf32> to vector<32x128xf32>
    %374 = arith.truncf %373 : vector<32x128xf32> to vector<32x128xbf16>
    %c0_158 = arith.constant 0 : index
    %c0_159 = arith.constant 0 : index
    %375 = vector.load %arg3[%c0_158, %c0_159] : memref<128x128xbf16, #tpu.memory_space<vmem>>, vector<128x128xbf16>
    %cst_160 = arith.constant dense<0.000000e+00> : vector<32x128xf32>
    %376 = tpu.matmul %374, %375, %cst_160 {dimension_numbers = #tpu.dot_dimension_numbers<[1], [0], [0], [1], [0, 0, 1, 1], [], []>} : vector<32x128xbf16>, vector<128x128xbf16>, vector<32x128xf32> -> vector<32x128xf32>
    %c35 = arith.constant 35 : index
    %c0_161 = arith.constant 0 : index
    %377 = vector.load %arg4[%c35, %c0_161] : memref<36x128xf32, #tpu.memory_space<vmem>>, vector<1x128xf32>
    %378 = vector.broadcast %377 : vector<1x128xf32> to vector<32x128xf32>
    %379 = arith.addf %376, %378 : vector<32x128xf32>
    %380 = vector.shape_cast %379 : vector<32x128xf32> to vector<2x16x128xf32>
    %381 = arith.mulf %380, %12 : vector<2x16x128xf32>
    %c0_162 = arith.constant 0 : index
    %c0_163 = arith.constant 0 : index
    %c0_164 = arith.constant 0 : index
    %382 = vector.load %arg5[%c0_162, %c0_163, %c0_164] : memref<2x16x128xf32, #tpu.memory_space<vmem>>, vector<2x16x128xf32>
    tpu.vector_store %arg5[%c0_162, %c0_163, %c0_164], %381 {strides = array<i32>} : memref<2x16x128xf32, #tpu.memory_space<vmem>>, vector<2x16x128xf32>,
    return
  }
}

</mosaic_0001>

<bundles_post_ra>
// kernel: tpu_custom_call.1
= control target key start
LH: loop header
LB: loop body
LE: loop exit
PB: predicated region body
PF: predicated region fallthrough
CT: control target
= control target key end

     0   :  { %10 = vsyncpa [#allocation6], 0  ;;  %s1755_s0 = inlined_call_operand.hbm [shape: s32[2], index: 0, kind: input, shape index: {}]   ;;  %s1756_s1 = inlined_call_operand.hbm [shape: f32[2,16,128], index: 1, kind: input, shape index: {}]   ;;  %s1757_s2 = inlined_call_operand.hbm [shape: bf16[128,256], index: 2, kind: input, shape index: {}]   ;;  %s1758_s3 = inlined_call_operand.hbm [shape: bf16[128,128], index: 3, kind: input, shape index: {}]   ;;  %s1759_s4 = inlined_call_operand.hbm [shape: f32[36,128], index: 4, kind: input, shape index: {}]   ;;  %s1760_s5 = inlined_call_operand.hbm [shape: f32[2,16,128], index: 5, kind: output, shape index: {}]  }
   0x1   :  { %11 = vsyncpa [#allocation4], 0 }
   0x2   :  { %12 = vsyncpa [#allocation9], 0 }
   0x3   :  { %13 = vsyncpa [#allocation12], 0 }
   0x4   :  { %14 = vsyncpa [#allocation5], 0  ;;  %s1403_s18 = smov [#allocation8]   ;;  %s1404_s20 = smov [#allocation7]  }
   0x5   :  { %s40_s19 = sshll.u32 %s1403_s18, 4  ;;  %s28_s21 = sshll.u32 %s1404_s20, 4  ;;  %s41_s19 = int_to_ptr.vmem [resolvable:$true] %s40_s19  ;;  %s29_s21 = int_to_ptr.vmem [resolvable:$true] %s28_s21 }
   0x6   :  { %s1293_s22 = scalar_lea.vmem %s41_s19, 2048  ;;  %p1298_p1 = scmp.lt.s32.totalorder %s41_s19, %s41_s19 }
   0x7   :  { %p1294_p0 = scmp.ne.s32.totalorder %s41_s19, %s1293_s22  ;;  %p1299_p2 = scmp.lt.s32.totalorder %s1293_s22, %s1293_s22 }
   0x9   :  { %p1300_p3 = por %p1299_p2, %p1298_p1 }
   0xb   :  { %p1301_p4 = pnand %p1300_p3, %p1294_p0 }
   0xd   :  { %1304 = shalt.err (!%p1301_p4)
}
   0xe   :  { %s1405_s23 = smov 128   ;;  %s1406_s24 = smov 8  }
   0xf   :  { %46 = dma.hbm_to_vmem [thread:$0]  %s1757_s2, 2048, %s41_s19, [#allocation9], %s1405_s23, %s1405_s23, %s1406_s24  }
  0x10   :  { %s1407_s27 = smov [#allocation3]   ;;  %s1321_s30 = scalar_lea.vmem %s29_s21, 512 }
  0x11   :  { %22 = dma.hbm_to_smem %s1755_s0, 16, %s1407_s27, [#allocation6]  }
  0x12   :  { %p1322_p5 = scmp.ne.s32.totalorder %s29_s21, %s1321_s30  ;;  %p1326_p6 = scmp.lt.s32.totalorder %s29_s21, %s29_s21 }
  0x13   :  { %p1327_p7 = scmp.lt.s32.totalorder %s1321_s30, %s1321_s30 }
  0x15   :  { %p1328_p8 = por %p1327_p7, %p1326_p6 }
  0x17   :  { %p1329_p9 = pnand %p1328_p8, %p1322_p5 }
  0x19   :  { %1332 = shalt.err (!%p1329_p9)
}
  0x1a   :  { %34 = dma.hbm_to_vmem [thread:$0]  %s1756_s1, 512, %s29_s21, [#allocation4], %s1405_s23, %s1405_s23, %s1406_s24  }
  0x1b   :  { %s1408_s2 = smov [#allocation10]  }
  0x1c   :  { %s52_s8 = sshll.u32 %s1408_s2, 4  ;;  %s53_s8 = int_to_ptr.vmem [resolvable:$true] %s52_s8 }
  0x1d   :  { %s1341_s9 = scalar_lea.vmem %s53_s8, 1024  ;;  %p1346_p11 = scmp.lt.s32.totalorder %s53_s8, %s53_s8 }
  0x1e   :  { %p1342_p10 = scmp.ne.s32.totalorder %s53_s8, %s1341_s9  ;;  %p1347_p12 = scmp.lt.s32.totalorder %s1341_s9, %s1341_s9 }
  0x20   :  { %p1348_p13 = por %p1347_p12, %p1346_p11 }
  0x22   :  { %p1349_p0 = pnand %p1348_p13, %p1342_p10 }
  0x24   :  { %1352 = shalt.err (!%p1349_p0)
}
  0x25   :  { %s1409_s0 = smov 64   ;;  %s1410_s10 = smov 4  }
  0x26   :  { %58 = dma.hbm_to_vmem [thread:$0]  %s1758_s3, 1024, %s53_s8, [#allocation9], %s1409_s0, %s1409_s0, %s1410_s10  }
  0x27   :  { %s1411_s13 = smov [#allocation11]  }
  0x28   :  { %s64_s14 = sshll.u32 %s1411_s13, 4  ;;  %s65_s14 = int_to_ptr.vmem [resolvable:$true] %s64_s14 }
  0x29   :  { %s1361_s1 = scalar_lea.vmem %s65_s14, 640  ;;  %p1366_p2 = scmp.lt.s32.totalorder %s65_s14, %s65_s14 }
  0x2a   :  { %p1362_p1 = scmp.ne.s32.totalorder %s65_s14, %s1361_s1  ;;  %p1367_p3 = scmp.lt.s32.totalorder %s1361_s1, %s1361_s1 }
  0x2c   :  { %p1368_p4 = por %p1367_p3, %p1366_p2 }
  0x2e   :  { %p1369_p5 = pnand %p1368_p4, %p1362_p1 }
  0x30   :  { %1372 = shalt.err (!%p1369_p5)
}
  0x31   :  { %70 = dma.hbm_to_vmem [thread:$0]  %s1759_s4, 640, %s65_s14, [#allocation12], %s1405_s23, %s1405_s23, %s1406_s24  }
  0x32   :  { %1393 = dma.done.wait [#allocation6], 16  }
  0x33   :  { %1394 = vsyncadd [#allocation6], 4294967280 }
  0x34   :  { %1395 = dma.done.wait [#allocation4], 512  }
  0x35   :  { %1396 = vsyncadd [#allocation4], 4294966784 }
  0x36   :  { %1397 = dma.done.wait [#allocation9], 3072  }
  0x37   :  { %1398 = vsyncadd [#allocation9], 4294964224 }
  0x38   :  { %1399 = dma.done.wait [#allocation12], 640  }
  0x39   :  { %1400 = vsyncadd [#allocation12], 4294966656 }
  0x3a   :  { %86 = sfence }
  0x3b   :  { %v1469_v0 = vld [vmem:[#allocation7] sm:$0xff]  ;;  %v1471_v1 = vld [vmem:[#allocation7 + $0x8] sm:$0xff]  ;;  %v1478_v4 = vld [vmem:[#allocation7 + $0x10] sm:$0xff]  ;;  %v1412_v23 = vmov 0   ;;  %s1513_s3 = sld [smem:[#allocation3]]  ;;  %s1414_s17 = smov [#allocation13]  }
  0x3c   :  { %111 = vadd.xlane.f32.xlu0 %v1469_v0  ;;  %v119_v2 = vmul.f32 %v1469_v0, %v1469_v0  ;;  %v120_v3 = vmul.f32 %v1471_v1, %v1471_v1  ;;  %v1481_v5 = vld [vmem:[#allocation7 + $0x18] sm:$0xff]  ;;  %v121_v6 = vmul.f32 %v1478_v4, %v1478_v4  ;;  %v1214_v10 = vld [vmem:[#allocation8 + $0x64] ss:$8 sps:$4 sm:$0xff]   ;;  %v1216_v11 = vld [vmem:[#allocation8 + $0x60] ss:$8 sps:$4 sm:$0xff]   ;;  %297 = vmatprep.mubr.bf16.mxu0 %v1412_v23  ;;  %s1526_s4 = sld [smem:[#allocation3 + $0x1]] }
  0x3d   :  { %v1211_v7 = vld [vmem:[#allocation8 + $0x74] ss:$8 sps:$4 sm:$0xff]   ;;  %v1213_v8 = vld [vmem:[#allocation8 + $0x70] ss:$8 sps:$4 sm:$0xff]   ;;  %v122_v9 = vmul.f32 %v1481_v5, %v1481_v5  ;;  %v1220_v14 = vld [vmem:[#allocation8 + $0x44] ss:$8 sps:$4 sm:$0xff]  }
  0x3e   :  { %123 = vadd.xlane.f32.xlu1 %v119_v2  ;;  %265 = vmatprep.subr.bf16.mxu0 %v1211_v7  ;;  %v1217_v12 = vld [vmem:[#allocation8 + $0x54] ss:$8 sps:$4 sm:$0xff]   ;;  %v1219_v13 = vld [vmem:[#allocation8 + $0x50] ss:$8 sps:$4 sm:$0xff]   ;;  %v1222_v15 = vld [vmem:[#allocation8 + $0x40] ss:$8 sps:$4 sm:$0xff]  }
  0x3f   :  { %266 = vmatpush1.bf16.msra.mxu0 %v1213_v8  ;;  %v1223_v16 = vld [vmem:[#allocation8 + $0x34] ss:$8 sps:$4 sm:$0xff]   ;;  %v1225_v17 = vld [vmem:[#allocation8 + $0x30] ss:$8 sps:$4 sm:$0xff]   ;;  %v1226_v18 = vld [vmem:[#allocation8 + $0x24] ss:$8 sps:$4 sm:$0xff]  }
  0x40   :  { %113 = vadd.xlane.f32.xlu0 %v1471_v1  ;;  %267 = vmatprep.subr.bf16.mxu0 %v1214_v10  ;;  %v1228_v19 = vld [vmem:[#allocation8 + $0x20] ss:$8 sps:$4 sm:$0xff]   ;;  %v1229_v20 = vld [vmem:[#allocation8 + $0x14] ss:$8 sps:$4 sm:$0xff]   ;;  %v1231_v21 = vld [vmem:[#allocation8 + $0x10] ss:$8 sps:$4 sm:$0xff]  }
  0x41   :  { %v1232_v22 = vld [vmem:[#allocation8 + $0x4] ss:$8 sps:$4 sm:$0xff]   ;;  %v1234_v24 = vld [vmem:[#allocation8] ss:$8 sps:$4 sm:$0xff]   ;;  %s1081_s18 = sshll.u32 %s1414_s17, 4  ;;  %s1082_s18 = int_to_ptr.vmem [resolvable:$true] %s1081_s18 }
  0x42   :  { %125 = vadd.xlane.f32.xlu1 %v120_v3  ;;  %s1373_s19 = scalar_lea.vmem %s1082_s18, 512  ;;  %p1378_p7 = scmp.lt.s32.totalorder %s1082_s18, %s1082_s18 }
  0x43   :  { %268 = vmatpush1.bf16.msra.mxu0 %v1216_v11  ;;  %v1413_v11 = vmov 0.0   ;;  %p1374_p6 = scmp.ne.s32.totalorder %s1082_s18, %s1373_s19  ;;  %p1379_p8 = scmp.lt.s32.totalorder %s1373_s19, %s1373_s19 }
  0x44   :  { %115 = vadd.xlane.f32.xlu0 %v1478_v4  ;;  %269 = vmatprep.subr.bf16.mxu0 %v1217_v12  ;;  %368 = vst [vmem:[#allocation2] sm:$0xff] %v1413_v11  ;;  %369 = vst [vmem:[#allocation2 + $0x8] sm:$0xff] %v1413_v11  ;;  %v1239_v12 = vld [vmem:[#allocation10 + $0x18] sm:$0xff]  }
  0x45   :  { %370 = vst [vmem:[#allocation2 + $0x30] sm:$0xff] %v1413_v11  ;;  %371 = vst [vmem:[#allocation2 + $0x38] sm:$0xff] %v1413_v11  ;;  %p1380_p9 = por %p1379_p8, %p1378_p7 }
  0x46   :  { %117 = vadd.xlane.f32.xlu1 %v1481_v5  ;;  %372 = vst [vmem:[#allocation2 + $0x20] sm:$0xff] %v1413_v11  ;;  %373 = vst [vmem:[#allocation2 + $0x28] sm:$0xff] %v1413_v11 }
  0x47   :  { %270 = vmatpush1.bf16.msra.mxu0 %v1219_v13  ;;  %374 = vst [vmem:[#allocation2 + $0x50] sm:$0xff] %v1413_v11  ;;  %375 = vst [vmem:[#allocation2 + $0x58] sm:$0xff] %v1413_v11  ;;  %v1240_v13 = vld [vmem:[#allocation10 + $0x10] sm:$0xff]   ;;  %p1381_p10 = pnand %p1380_p9, %p1374_p6 }
  0x48   :  { %127 = vadd.xlane.f32.xlu0 %v121_v6  ;;  %271 = vmatprep.subr.bf16.mxu0 %v1220_v14  ;;  %v1241_v14 = vld [vmem:[#allocation10 + $0x8] sm:$0xff]  }
  0x4a   :  { %129 = vadd.xlane.f32.xlu1 %v122_v9 }
  0x4b   :  { %272 = vmatpush1.bf16.msra.mxu0 %v1222_v15  ;;  %v1242_v15 = vld [vmem:[#allocation10] sm:$0xff]  }
  0x4c   :  { %273 = vmatprep.subr.bf16.mxu0 %v1223_v16 }
  0x4f   :  { %274 = vmatpush1.bf16.msra.mxu0 %v1225_v17  ;;  %v1118_v17 = vld [vmem:[#allocation11 + $0x20] ss:$0 sm:$0xff] }
  0x50   :  { %275 = vmatprep.subr.bf16.mxu0 %v1226_v18 }
  0x53   :  { %276 = vmatpush1.bf16.msra.mxu0 %v1228_v19 }
  0x54   :  { %277 = vmatprep.subr.bf16.mxu0 %v1229_v20 }
  0x57   :  { %278 = vmatpush1.bf16.msra.mxu0 %v1231_v21 }
  0x58   :  { %279 = vmatprep.subr.bf16.mxu0 %v1232_v22 }
  0x5b   :  { %280 = vmatpush1.bf16.msra.mxu0 %v1234_v24 }
  0xc5   :  { %v112_v25 = vpop.xlane.xlu0 %111 }
  0xc6   :  { %v131_v26 = vmul.f32 0.125, %v112_v25 }
  0xc7   :  { %v124_v27 = vpop.xlane.xlu1 %123 }
  0xc8   :  { %v139_v28 = vmul.f32 %v131_v26, %v131_v26  ;;  %v135_v29 = vmul.f32 0.125, %v124_v27  ;;  %v151_v58 = vsub.f32 %v1469_v0, %v131_v26  ;;  %v1235_v0 = vld [vmem:[#allocation10 + $0x38] sm:$0xff]  }
  0xc9   :  { %v114_v30 = vpop.xlane.xlu0 %113  ;;  %1179 = vmatprep.subr.bf16.mxu1 %v1235_v0 }
  0xca   :  { %v143_v31 = vsub.f32 %v135_v29, %v139_v28  ;;  %v132_v32 = vmul.f32 0.125, %v114_v30  ;;  %1180 = vmatpush3.bf16.msra.mxu1 %v1235_v0 }
  0xcb   :  { %v126_v33 = vpop.xlane.xlu1 %125 }
  0xcc   :  { %v147_v34 = vmax.f32 %v143_v31, 0.0  ;;  %v140_v35 = vmul.f32 %v132_v32, %v132_v32  ;;  %v136_v36 = vmul.f32 0.125, %v126_v33  ;;  %v152_v59 = vsub.f32 %v1471_v1, %v132_v32  ;;  %v1236_v1 = vld [vmem:[#allocation10 + $0x30] sm:$0xff]   ;;  %v1509_v33 = vld [vmem:[#allocation11] ss:$0 sm:$0xff] }
  0xcd   :  { %v116_v37 = vpop.xlane.xlu0 %115  ;;  %1181 = vmatprep.subr.bf16.mxu1 %v1236_v1 }
  0xce   :  { %v155_v38 = vadd.f32 1e-05, %v147_v34  ;;  %v144_v39 = vsub.f32 %v136_v36, %v140_v35  ;;  %v133_v40 = vmul.f32 0.125, %v116_v37  ;;  %1182 = vmatpush3.bf16.msra.mxu1 %v1236_v1  ;;  %v381_v34 = vld [vmem:[#allocation2 + $0x1] sm:$0xff] }
  0xcf   :  { %v118_v41 = vpop.xlane.xlu1 %117  ;;  %v1511_v35 = vld [vmem:[#allocation11 + $0x1] ss:$0 sm:$0xff]  ;;  %v398_v36 = vld [vmem:[#allocation2 + $0x2] sm:$0xff] }
  0xd0   :  { %v148_v42 = vmax.f32 %v144_v39, 0.0  ;;  %v141_v43 = vmul.f32 %v133_v40, %v133_v40  ;;  %v134_v44 = vmul.f32 0.125, %v118_v41  ;;  %1243 = vrsqrt.f32 %v155_v38  ;;  %v1517_v41 = vld [vmem:[#allocation11 + $0x2] ss:$0 sm:$0xff]  ;;  %v1532_v1 = vld [vmem:[#allocation11 + $0x5] ss:$0 sm:$0xff] }
  0xd1   :  { %v128_v45 = vpop.xlane.xlu0 %127  ;;  %v153_v3 = vsub.f32 %v1478_v4, %v133_v40  ;;  %v1237_v4 = vld [vmem:[#allocation10 + $0x28] sm:$0xff]   ;;  %v389_v39 = vmul.f32 %v1509_v33, %v381_v34  ;;  %v406_v40 = vmul.f32 %v1511_v35, %v398_v36  ;;  %v468_v34 = vld [vmem:[#allocation2 + $0x36] sm:$0xff] }
  0xd2   :  { %v156_v46 = vadd.f32 1e-05, %v148_v42  ;;  %v137_v47 = vmul.f32 0.125, %v128_v45  ;;  %v142_v49 = vmul.f32 %v134_v44, %v134_v44  ;;  %v154_v6 = vsub.f32 %v1481_v5, %v134_v44  ;;  %1183 = vmatprep.subr.bf16.mxu1 %v1237_v4  ;;  %v1238_v5 = vld [vmem:[#allocation10 + $0x20] sm:$0xff]  }
  0xd3   :  { %v130_v48 = vpop.xlane.xlu1 %129  ;;  %1184 = vmatpush3.bf16.msra.mxu1 %v1237_v4  ;;  %v415_v42 = vld [vmem:[#allocation2 + $0x3] sm:$0xff]  ;;  %v92_v44 = vlaneseq }
  0xd4   :  { %1245 = vrsqrt.f32 %v156_v46  ;;  %v145_v50 = vsub.f32 %v137_v47, %v141_v43  ;;  %v138_v51 = vmul.f32 0.125, %v130_v48  ;;  %1185 = vmatprep.subr.bf16.mxu1 %v1238_v5  ;;  %v383_v46 = vld [vmem:[#allocation2 + $0x31] sm:$0xff]  ;;  %v410_v48 = vadd.f32 %v406_v40, %v389_v39  ;;  %v466_v4 = vld [vmem:[#allocation2 + $0x6] sm:$0xff] }
  0xd5   :  { %v400_v47 = vld [vmem:[#allocation2 + $0x32] sm:$0xff] }
  0xd6   :  { %v149_v52 = vmax.f32 %v145_v50, 0.0  ;;  %v146_v53 = vsub.f32 %v138_v51, %v142_v49  ;;  %v423_v49 = vmul.f32 %v1517_v41, %v415_v42  ;;  %v1520_v50 = vld [vmem:[#allocation11 + $0x3] ss:$0 sm:$0xff]  ;;  %v432_v51 = vld [vmem:[#allocation2 + $0x4] sm:$0xff] }
  0xd7   :  { %1186 = vmatpush3.bf16.msra.mxu1 %v1238_v5 }
  0xd8   :  { %v157_v54 = vadd.f32 1e-05, %v149_v52  ;;  %v150_v55 = vmax.f32 %v146_v53, 0.0  ;;  %1187 = vmatprep.subr.bf16.mxu1 %v1239_v12  ;;  %v93_v53 = vshrl.u32 %v92_v44, 7  ;;  %v1561_v44 = vld [vmem:[#allocation11 + $0x7] ss:$0 sm:$0xff] }
  0xda   :  { %1247 = vrsqrt.f32 %v157_v54  ;;  %v158_v56 = vadd.f32 1e-05, %v150_v55  ;;  %v391_v54 = vmul.f32 %v1509_v33, %v383_v46  ;;  %v408_v55 = vmul.f32 %v1511_v35, %v400_v47  ;;  %v485_v46 = vld [vmem:[#allocation2 + $0x37] sm:$0xff] }
  0xdb   :  { %1188 = vmatpush3.bf16.msra.mxu1 %v1239_v12 }
  0xdc   :  { %1249 = vrsqrt.f32 %v158_v56  ;;  %1189 = vmatprep.subr.bf16.mxu1 %v1240_v13 }
  0xdd   :  { %v1244_v57 = vpop.eup %1243 }
  0xde   :  { %v163_v61 = vmul.f32 %v1244_v57, %v151_v58  ;;  %v96_v57 = vstv %s1513_s3  ;;  %v417_v58 = vld [vmem:[#allocation2 + $0x33] sm:$0xff] }
  0xdf   :  { %1190 = vmatpush3.bf16.msra.mxu1 %v1240_v13  ;;  %vm97_vm0 = vcmp.lt.s32.totalorder %v93_v53, %v96_v57 }
  0xe0   :  { %1191 = vmatprep.subr.bf16.mxu1 %v1241_v14  ;;  %v1536_v13 = vsel %vm97_vm0, 1.0, %v1413_v11 }
  0xe1   :  { %v1246_v60 = vpop.eup %1245 }
  0xe2   :  { %v164_v62 = vmul.f32 %v1246_v60, %v152_v59  ;;  %v427_v59 = vadd.f32 %v423_v49, %v410_v48  ;;  %v440_v60 = vmul.f32 %v1520_v50, %v432_v51  ;;  %v1569_v51 = vld [vmem:[#allocation11 + $0x8] ss:$0 sm:$0xff] }
  0xe3   :  { %1192 = vmatpush3.bf16.msra.mxu1 %v1241_v14 }
  0xe4   :  { %v167_v63 = vpack.c.bf16 %v164_v62, %v163_v61  ;;  %1193 = vmatprep.subr.bf16.mxu1 %v1242_v15  ;;  %v1528_v61 = vld [vmem:[#allocation11 + $0x4] ss:$0 sm:$0xff]  ;;  %v449_v62 = vld [vmem:[#allocation2 + $0x5] sm:$0xff] }
  0xe5   :  { %v457_v0 = vmul.f32 %v1528_v61, %v449_v62 }
  0xe6   :  { %298 = vmatmul.mubr.bf16.vlgmr.msra.gmra.mxu0 %v167_v63 }
  0xe7   :  { %v1248_v2 = vpop.eup %1247  ;;  %307 = vmatprep.mubr.bf16.mxu0 %v1412_v23  ;;  %1194 = vmatpush3.bf16.msra.mxu1 %v1242_v15 }
  0xe8   :  { %v165_v8 = vmul.f32 %v1248_v2, %v153_v3  ;;  %v1117_v2 = vld [vmem:[#allocation11 + $0x1f] ss:$0 sm:$0xff]  ;;  %v412_v3 = vadd.f32 %v408_v55, %v391_v54 }
  0xe9   :  { %v1250_v7 = vpop.eup %1249 }
  0xea   :  { %v166_v9 = vmul.f32 %v1250_v7, %v154_v6  ;;  %v425_v6 = vmul.f32 %v1517_v41, %v417_v58 }
  0xec   :  { %v168_v10 = vpack.c.bf16 %v166_v9, %v165_v8  ;;  %v94_v8 = vadd.s32 8, %v93_v53  ;;  %v434_v9 = vld [vmem:[#allocation2 + $0x34] sm:$0xff]  ;;  %v429_v14 = vadd.f32 %v425_v6, %v412_v3 }
  0xed   :  { %v442_v15 = vmul.f32 %v1520_v50, %v434_v9 }
  0xee   :  { %308 = vmatmul.mubr.bf16.gmra.mxu0 %v168_v10  ;;  %v444_v10 = vadd.f32 %v440_v60, %v427_v59  ;;  %vm98_vm1 = vcmp.lt.s32.totalorder %v94_v8, %v96_v57 }
 0x1a6   :  { %v1501_v16 = vpop.f32.mrf.mxu0 }
 0x1a7   :  { %v323_v5 = vadd.f32 %v1117_v2, %v1501_v16 }
 0x1a8   :  { %v301_v18 = vpop.f32.mrf.mxu0 }
 0x1a9   :  { %v332_v19 = vadd.f32 %v1118_v17, %v301_v18  ;;  %v451_v18 = vld [vmem:[#allocation2 + $0x35] sm:$0xff] }
 0x1aa   :  { %v1503_v20 = vpop.f32.mrf.mxu0 }
 0x1ab   :  { %v1119_v21 = vmul.f32 -1.442695, %v332_v19  ;;  %v461_v19 = vadd.f32 %v457_v0, %v444_v10  ;;  %v324_v16 = vadd.f32 %v1117_v2, %v1503_v20 }
 0x1ac   :  { %v305_v22 = vpop.f32.mrf.mxu0 }
 0x1ad   :  { %1251 = vpow2.f32 %v1119_v21  ;;  %v333_v23 = vadd.f32 %v1118_v17, %v305_v22  ;;  %v474_v21 = vmul.f32 %v1532_v1, %v466_v4  ;;  %v104_v22 = vstv %s1526_s4 }
 0x1ae   :  { %v1505_v24 = vpop.f32.mrf.mxu0  ;;  %vm105_vm2 = vcmp.lt.s32.totalorder %v93_v53, %v104_v22  ;;  %vm106_vm3 = vcmp.lt.s32.totalorder %v94_v8, %v104_v22 }
 0x1af   :  { %v1120_v25 = vmul.f32 -1.442695, %v333_v23  ;;  %v1541_v23 = vld [vmem:[#allocation11 + $0x6] ss:$0 sm:$0xff]  ;;  %v478_v36 = vadd.f32 %v474_v21, %v461_v19  ;;  %v325_v20 = vadd.f32 %v1117_v2, %v1505_v24  ;;  %v1558_v40 = vsel %vm105_vm2, 1.0, %v1413_v11 }
 0x1b0   :  { %v311_v26 = vpop.f32.mrf.mxu0  ;;  %v508_v24 = vmul.f32 0.0, %v1561_v44  ;;  %v1572_v53 = vsel %vm106_vm3, 1.0, %v1413_v11  ;;  %v493_v58 = vmul.f32 %v1541_v23, %v485_v46  ;;  %v1605_v46 = vld [vmem:[#allocation11 + $0xc] ss:$0 sm:$0xff] }
 0x1b1   :  { %1253 = vpow2.f32 %v1120_v25  ;;  %v334_v27 = vadd.f32 %v1118_v17, %v311_v26  ;;  %v483_v25 = vld [vmem:[#allocation2 + $0x7] sm:$0xff] }
 0x1b2   :  { %v1507_v28 = vpop.f32.mrf.mxu0 }
 0x1b3   :  { %v1121_v29 = vmul.f32 -1.442695, %v334_v27  ;;  %v326_v49 = vadd.f32 %v1117_v2, %v1507_v28 }
 0x1b4   :  { %v315_v30 = vpop.f32.mrf.mxu0 }
 0x1b5   :  { %1255 = vpow2.f32 %v1121_v29  ;;  %v335_v31 = vadd.f32 %v1118_v17, %v315_v30  ;;  %v1548_v29 = vsel %vm98_vm1, 1.0, %v1413_v11  ;;  %v446_v30 = vadd.f32 %v442_v15, %v429_v14 }
 0x1b7   :  { %v1122_v32 = vmul.f32 -1.442695, %v335_v31  ;;  %v459_v31 = vmul.f32 %v1528_v61, %v451_v18  ;;  %v1589_v18 = vld [vmem:[#allocation11 + $0xa] ss:$0 sm:$0xff] }
 0x1b9   :  { %1257 = vpow2.f32 %v1122_v32  ;;  %v463_v42 = vadd.f32 %v459_v31, %v446_v30 }
 0x1ba   :  { %v1252_v37 = vpop.eup %1251 }
 0x1bb   :  { %v348_v38 = vadd.f32 1.0, %v1252_v37  ;;  %v491_v37 = vmul.f32 %v1541_v23, %v483_v25 }
 0x1bd   :  { %1259 = vrcp.f32 %v348_v38  ;;  %v495_v47 = vadd.f32 %v491_v37, %v478_v36  ;;  %v1596_v36 = vld [vmem:[#allocation11 + $0x17] ss:$0 sm:$0xff] }
 0x1be   :  { %v1254_v43 = vpop.eup %1253 }
 0x1bf   :  { %v349_v45 = vadd.f32 1.0, %v1254_v43  ;;  %v476_v43 = vmul.f32 %v1532_v1, %v468_v34  ;;  %v512_v28 = vadd.f32 %v508_v24, %v495_v47  ;;  %v1594_v34 = vld [vmem:[#allocation11 + $0xb] ss:$0 sm:$0xff] }
 0x1c1   :  { %1261 = vrcp.f32 %v349_v45  ;;  %v480_v57 = vadd.f32 %v476_v43, %v463_v42  ;;  %v1601_v42 = vmul.f32 0.0, %v1596_v36 }
 0x1c2   :  { %v1256_v52 = vpop.eup %1255 }
 0x1c3   :  { %v350_v56 = vadd.f32 1.0, %v1256_v52  ;;  %v497_v9 = vadd.f32 %v493_v58, %v480_v57 }
 0x1c5   :  { %1263 = vrcp.f32 %v350_v56  ;;  %v514_v25 = vadd.f32 %v508_v24, %v497_v9 }
 0x1c6   :  { %v1258_v63 = vpop.eup %1257 }
 0x1c7   :  { %v351_v7 = vadd.f32 1.0, %v1258_v63 }
 0x1c9   :  { %1265 = vrcp.f32 %v351_v7  ;;  %v1583_v7 = vld [vmem:[#allocation11 + $0x9] ss:$0 sm:$0xff] }
 0x1ca   :  { %v1260_v12 = vpop.eup %1259 }
 0x1cb   :  { %v360_v17 = vmul.f32 %v1260_v12, %v323_v5 }
 0x1cd   :  { %v1545_v26 = vmul.f32 %v1536_v13, %v360_v17 }
 0x1ce   :  { %v1262_v27 = vpop.eup %1261 }
 0x1cf   :  { %v361_v32 = vmul.f32 %v1262_v27, %v324_v16  ;;  %376 = vst [vmem:[#allocation2 + $0x10] sm:$0xff] %v1545_v26 }
 0x1d1   :  { %v1555_v38 = vmul.f32 %v1548_v29, %v361_v32 }
 0x1d2   :  { %v1264_v39 = vpop.eup %1263 }
 0x1d3   :  { %v362_v45 = vmul.f32 %v1264_v39, %v325_v20  ;;  %377 = vst [vmem:[#allocation2 + $0x18] sm:$0xff] %v1555_v38 }
 0x1d5   :  { %v1566_v48 = vmul.f32 %v1558_v40, %v362_v45 }
 0x1d6   :  { %v1266_v52 = vpop.eup %1265  ;;  %v382_v54 = vld [vmem:[#allocation2 + $0x9] sm:$0xff] }
 0x1d7   :  { %v399_v55 = vld [vmem:[#allocation2 + $0xa] sm:$0xff]  ;;  %378 = vst [vmem:[#allocation2 + $0x40] sm:$0xff] %v1566_v48  ;;  %v363_v59 = vmul.f32 %v1266_v52, %v326_v49  ;;  %v390_v60 = vmul.f32 %v1509_v33, %v382_v54  ;;  %v523_v6 = vmul.f32 %v1569_v51, %v382_v54 }
 0x1d8   :  { %v416_v56 = vld [vmem:[#allocation2 + $0xb] sm:$0xff]  ;;  %v407_v62 = vmul.f32 %v1511_v35, %v399_v55  ;;  %v538_v12 = vmul.f32 %v1583_v7, %v399_v55 }
 0x1d9   :  { %v433_v63 = vld [vmem:[#allocation2 + $0xc] sm:$0xff]  ;;  %v1579_v2 = vmul.f32 %v1572_v53, %v363_v59  ;;  %v424_v3 = vmul.f32 %v1517_v41, %v416_v56  ;;  %v527_v4 = vadd.f32 %v523_v6, %v512_v28  ;;  %v553_v39 = vmul.f32 %v1589_v18, %v416_v56 }
 0x1da   :  { %v411_v11 = vadd.f32 %v407_v62, %v390_v60  ;;  %v450_v8 = vld [vmem:[#allocation2 + $0xd] sm:$0xff]  ;;  %v441_v0 = vmul.f32 %v1520_v50, %v433_v63  ;;  %v568_v55 = vmul.f32 %v1594_v34, %v433_v63 }
 0x1db   :  { %379 = vst [vmem:[#allocation2 + $0x48] sm:$0xff] %v1579_v2  ;;  %v467_v5 = vld [vmem:[#allocation2 + $0xe] sm:$0xff]  ;;  %v458_v15 = vmul.f32 %v1528_v61, %v450_v8  ;;  %v542_v16 = vadd.f32 %v538_v12, %v527_v4  ;;  %v1612_v59 = vld [vmem:[#allocation11 + $0xd] ss:$0 sm:$0xff]  ;;  %v583_v6 = vmul.f32 %v1605_v46, %v450_v8 }
 0x1dc   :  { %v428_v10 = vadd.f32 %v424_v3, %v411_v11  ;;  %v484_v17 = vld [vmem:[#allocation2 + $0xf] sm:$0xff]  ;;  %v475_v32 = vmul.f32 %v1532_v1, %v467_v5 }
 0x1dd   :  { %v517_v24 = vld [vmem:[#allocation2 + $0x11] sm:$0xff]  ;;  %v557_v54 = vadd.f32 %v553_v39, %v542_v16 }
 0x1de   :  { %v445_v14 = vadd.f32 %v441_v0, %v428_v10  ;;  %v384_v19 = vld [vmem:[#allocation2 + $0x39] sm:$0xff]  ;;  %v1618_v0 = vld [vmem:[#allocation11 + $0xe] ss:$0 sm:$0xff] }
 0x1df   :  { %v401_v21 = vld [vmem:[#allocation2 + $0x3a] sm:$0xff]  ;;  %v392_v27 = vmul.f32 %v1509_v33, %v384_v19  ;;  %v525_v20 = vmul.f32 %v1569_v51, %v384_v19  ;;  %v532_v62 = vld [vmem:[#allocation2 + $0x12] sm:$0xff]  ;;  %v572_v3 = vadd.f32 %v568_v55, %v557_v54 }
 0x1e0   :  { %v418_v22 = vld [vmem:[#allocation2 + $0x3b] sm:$0xff]  ;;  %v409_v30 = vmul.f32 %v1511_v35, %v401_v21  ;;  %v462_v31 = vadd.f32 %v458_v15, %v445_v14  ;;  %v492_v35 = vmul.f32 %v1541_v23, %v484_v17  ;;  %v540_v52 = vmul.f32 %v1583_v7, %v401_v21  ;;  %v547_v12 = vld [vmem:[#allocation2 + $0x13] sm:$0xff] }
 0x1e1   :  { %v435_v37 = vld [vmem:[#allocation2 + $0x3c] sm:$0xff]  ;;  %v426_v33 = vmul.f32 %v1517_v41, %v418_v22  ;;  %v529_v49 = vadd.f32 %v525_v20, %v514_v25  ;;  %v509_v41 = vmul.f32 %v1561_v44, %v1545_v26  ;;  %v555_v11 = vmul.f32 %v1589_v18, %v418_v22 }
 0x1e2   :  { %v413_v43 = vadd.f32 %v409_v30, %v392_v27  ;;  %v479_v45 = vadd.f32 %v475_v32, %v462_v31  ;;  %v452_v47 = vld [vmem:[#allocation2 + $0x3d] sm:$0xff]  ;;  %v443_v57 = vmul.f32 %v1520_v50, %v435_v37  ;;  %v524_v50 = vmul.f32 %v1569_v51, %v517_v24  ;;  %v562_v27 = vld [vmem:[#allocation2 + $0x14] sm:$0xff] }
 0x1e3   :  { %v469_v60 = vld [vmem:[#allocation2 + $0x3e] sm:$0xff]  ;;  %v544_v28 = vadd.f32 %v540_v52, %v529_v49  ;;  %v460_v63 = vmul.f32 %v1528_v61, %v452_v47  ;;  %v570_v15 = vmul.f32 %v1594_v34, %v435_v37  ;;  %v587_v19 = vadd.f32 %v583_v6, %v572_v3  ;;  %v1624_v61 = vld [vmem:[#allocation11 + $0xf] ss:$0 sm:$0xff] }
 0x1e4   :  { %v430_v56 = vadd.f32 %v426_v33, %v413_v43  ;;  %v496_v58 = vadd.f32 %v492_v35, %v479_v45  ;;  %v486_v4 = vld [vmem:[#allocation2 + $0x3f] sm:$0xff]  ;;  %v598_v21 = vmul.f32 %v1612_v59, %v467_v5  ;;  %v477_v25 = vmul.f32 %v1532_v1, %v469_v60  ;;  %v1630_v33 = vld [vmem:[#allocation11 + $0x10] ss:$0 sm:$0xff]  ;;  %v577_v45 = vld [vmem:[#allocation2 + $0x15] sm:$0xff] }
 0x1e5   :  { %v559_v14 = vadd.f32 %v555_v11, %v544_v28  ;;  %v539_v16 = vmul.f32 %v1583_v7, %v532_v62  ;;  %v585_v31 = vmul.f32 %v1605_v46, %v452_v47  ;;  %v613_v20 = vmul.f32 %v1618_v0, %v484_v17  ;;  %v518_v1 = vld [vmem:[#allocation2 + $0x41] sm:$0xff] }
 0x1e6   :  { %v447_v9 = vadd.f32 %v443_v57, %v430_v56  ;;  %v513_v10 = vadd.f32 %v509_v41, %v496_v58  ;;  %v602_v32 = vadd.f32 %v598_v21, %v587_v19  ;;  %v494_v37 = vmul.f32 %v1541_v23, %v486_v4  ;;  %v1638_v56 = vld [vmem:[#allocation11 + $0x11] ss:$0 sm:$0xff]  ;;  %v533_v57 = vld [vmem:[#allocation2 + $0x42] sm:$0xff]  ;;  %v592_v58 = vld [vmem:[#allocation2 + $0x16] sm:$0xff] }
 0x1e7   :  { %v574_v30 = vadd.f32 %v570_v15, %v559_v14  ;;  %v554_v5 = vmul.f32 %v1589_v18, %v547_v12  ;;  %v600_v49 = vmul.f32 %v1612_v59, %v469_v60  ;;  %v628_v47 = vmul.f32 %v1624_v61, %v1545_v26 }
 0x1e8   :  { %v464_v22 = vadd.f32 %v460_v63, %v447_v9  ;;  %v528_v8 = vadd.f32 %v524_v50, %v513_v10  ;;  %v617_v52 = vadd.f32 %v613_v20, %v602_v32  ;;  %v511_v17 = vmul.f32 %v1561_v44, %v1566_v48  ;;  %v1644_v44 = vld [vmem:[#allocation11 + $0x12] ss:$0 sm:$0xff]  ;;  %v548_v63 = vld [vmem:[#allocation2 + $0x43] sm:$0xff]  ;;  %v607_v10 = vld [vmem:[#allocation2 + $0x17] sm:$0xff] }
 0x1e9   :  { %v589_v35 = vadd.f32 %v585_v31, %v574_v30  ;;  %v569_v23 = vmul.f32 %v1594_v34, %v562_v27  ;;  %v615_v28 = vmul.f32 %v1618_v0, %v486_v4  ;;  %v643_v60 = vmul.f32 %v1630_v33, %v517_v24 }
 0x1ea   :  { %v481_v39 = vadd.f32 %v477_v25, %v464_v22  ;;  %v543_v43 = vadd.f32 %v539_v16, %v528_v8  ;;  %v632_v11 = vadd.f32 %v628_v47, %v617_v52  ;;  %v526_v26 = vmul.f32 %v1569_v51, %v518_v1  ;;  %v1651_v22 = vld [vmem:[#allocation11 + $0x13] ss:$0 sm:$0xff]  ;;  %v563_v25 = vld [vmem:[#allocation2 + $0x44] sm:$0xff]  ;;  %v1664_v47 = vld [vmem:[#allocation11 + $0x15] ss:$0 sm:$0xff] }
 0x1eb   :  { %v604_v41 = vadd.f32 %v600_v49, %v589_v35  ;;  %v584_v9 = vmul.f32 %v1605_v46, %v577_v45  ;;  %v630_v14 = vmul.f32 %v1624_v61, %v1566_v48  ;;  %v658_v4 = vmul.f32 %v1638_v56, %v532_v62 }
 0x1ec   :  { %v498_v54 = vadd.f32 %v494_v37, %v481_v39  ;;  %v558_v55 = vadd.f32 %v554_v5, %v543_v43  ;;  %v647_v15 = vadd.f32 %v643_v60, %v632_v11  ;;  %v541_v24 = vmul.f32 %v1583_v7, %v533_v57  ;;  %v1657_v39 = vld [vmem:[#allocation11 + $0x14] ss:$0 sm:$0xff]  ;;  %v578_v7 = vld [vmem:[#allocation2 + $0x45] sm:$0xff]  ;;  %v637_v37 = vld [vmem:[#allocation2 + $0x19] sm:$0xff] }
 0x1ed   :  { %v619_v50 = vadd.f32 %v615_v28, %v604_v41  ;;  %v599_v51 = vmul.f32 %v1612_v59, %v592_v58  ;;  %v645_v16 = vmul.f32 %v1630_v33, %v518_v1  ;;  %v673_v31 = vmul.f32 %v1644_v44, %v547_v12  ;;  %v1670_v60 = vld [vmem:[#allocation11 + $0x16] ss:$0 sm:$0xff] }
 0x1ee   :  { %v515_v3 = vadd.f32 %v511_v17, %v498_v54  ;;  %v573_v6 = vadd.f32 %v569_v23, %v558_v55  ;;  %v662_v30 = vadd.f32 %v658_v4, %v647_v15  ;;  %v556_v48 = vmul.f32 %v1589_v18, %v548_v63  ;;  %v593_v54 = vld [vmem:[#allocation2 + $0x46] sm:$0xff]  ;;  %v652_v17 = vld [vmem:[#allocation2 + $0x1a] sm:$0xff] }
 0x1ef   :  { %v634_v8 = vadd.f32 %v630_v14, %v619_v50  ;;  %v614_v62 = vmul.f32 %v1618_v0, %v607_v10  ;;  %v660_v5 = vmul.f32 %v1638_v56, %v533_v57  ;;  %v688_v49 = vmul.f32 %v1651_v22, %v562_v27 }
 0x1f0   :  { %v530_v19 = vadd.f32 %v526_v26, %v515_v3  ;;  %v588_v21 = vadd.f32 %v584_v9, %v573_v6  ;;  %v677_v35 = vadd.f32 %v673_v31, %v662_v30  ;;  %v571_v52 = vmul.f32 %v1594_v34, %v563_v25  ;;  %v608_v3 = vld [vmem:[#allocation2 + $0x47] sm:$0xff]  ;;  %v667_v26 = vld [vmem:[#allocation2 + $0x1b] sm:$0xff]  ;;  %v1682_v30 = vld [vmem:[#allocation11 + $0x18] ss:$0 sm:$0xff] }
 0x1f1   :  { %v649_v43 = vadd.f32 %v645_v16, %v634_v8  ;;  %v629_v18 = vmul.f32 %v1624_v61, %v1555_v38  ;;  %v675_v23 = vmul.f32 %v1644_v44, %v548_v63  ;;  %v703_v57 = vmul.f32 %v1657_v39, %v577_v45  ;;  %v1684_v31 = vld [vmem:[#allocation2 + $0x1d] sm:$0xff] }
 0x1f2   :  { %v545_v32 = vadd.f32 %v541_v24, %v530_v19  ;;  %v603_v20 = vadd.f32 %v599_v51, %v588_v21  ;;  %v692_v41 = vadd.f32 %v688_v49, %v677_v35  ;;  %v586_v27 = vmul.f32 %v1605_v46, %v578_v7  ;;  %v1676_v46 = vld [vmem:[#allocation2 + $0x1c] sm:$0xff]  ;;  %v653_v35 = vld [vmem:[#allocation2 + $0x4a] sm:$0xff] }
 0x1f3   :  { %v664_v55 = vadd.f32 %v660_v5, %v649_v43  ;;  %v644_v34 = vmul.f32 %v1630_v33, %v637_v37  ;;  %v690_v9 = vmul.f32 %v1651_v22, %v563_v25  ;;  %v718_v14 = vmul.f32 %v1664_v47, %v592_v58  ;;  %v1693_v5 = vld [vmem:[#allocation11 + $0x19] ss:$0 sm:$0xff]  ;;  %v1695_v49 = vld [vmem:[#allocation2 + $0x1e] sm:$0xff] }
 0x1f4   :  { %v560_v1 = vadd.f32 %v556_v48, %v545_v32  ;;  %v618_v12 = vadd.f32 %v614_v62, %v603_v20  ;;  %v707_v50 = vadd.f32 %v703_v57, %v692_v41  ;;  %v601_v15 = vmul.f32 %v1612_v59, %v593_v54  ;;  %v638_v59 = vld [vmem:[#allocation2 + $0x49] sm:$0xff]  ;;  %v1704_v57 = vld [vmem:[#allocation2 + $0x1f] sm:$0xff] }
 0x1f5   :  { %v679_v6 = vadd.f32 %v675_v23, %v664_v55  ;;  %v659_v4 = vmul.f32 %v1638_v56, %v652_v17  ;;  %v705_v24 = vmul.f32 %v1657_v39, %v578_v7  ;;  %v733_v51 = vmul.f32 %v1670_v60, %v607_v10  ;;  %v1702_v23 = vld [vmem:[#allocation11 + $0x1a] ss:$0 sm:$0xff]  ;;  %v668_v41 = vld [vmem:[#allocation2 + $0x4b] sm:$0xff] }
 0x1f6   :  { %v575_v28 = vadd.f32 %v571_v52, %v560_v1  ;;  %v633_v11 = vadd.f32 %v629_v18, %v618_v12  ;;  %v722_v21 = vadd.f32 %v718_v14, %v707_v50  ;;  %v616_v25 = vmul.f32 %v1618_v0, %v608_v3  ;;  %v683_v50 = vld [vmem:[#allocation2 + $0x4c] sm:$0xff] }
 0x1f7   :  { %v694_v19 = vadd.f32 %v690_v9, %v679_v6  ;;  %v674_v58 = vmul.f32 %v1644_v44, %v667_v26  ;;  %v720_v48 = vmul.f32 %v1664_v47, %v593_v54  ;;  %v748_v62 = vmul.f32 %v1596_v36, %v1555_v38  ;;  %v757_v9 = vld [vmem:[#allocation2 + $0x21] sm:$0xff] }
 0x1f8   :  { %v590_v63 = vadd.f32 %v586_v27, %v575_v28  ;;  %v648_v45 = vadd.f32 %v644_v34, %v633_v11  ;;  %v737_v20 = vadd.f32 %v733_v51, %v722_v21  ;;  %v631_v10 = vmul.f32 %v1624_v61, %v1579_v2 }
 0x1f9   :  { %v709_v32 = vadd.f32 %v705_v24, %v694_v19  ;;  %v689_v43 = vmul.f32 %v1651_v22, %v1676_v46  ;;  %v735_v52 = vmul.f32 %v1670_v60, %v608_v3  ;;  %v763_v18 = vmul.f32 %v1682_v30, %v637_v37  ;;  %v772_v19 = vld [vmem:[#allocation2 + $0x22] sm:$0xff]  ;;  %v698_v24 = vld [vmem:[#allocation2 + $0x4d] sm:$0xff] }
 0x1fa   :  { %v605_v8 = vadd.f32 %v601_v15, %v590_v63  ;;  %v663_v16 = vadd.f32 %v659_v4, %v648_v45  ;;  %v752_v12 = vadd.f32 %v748_v62, %v737_v20  ;;  %v646_v54 = vmul.f32 %v1630_v33, %v638_v59  ;;  %v1714_v4 = vld [vmem:[#allocation11 + $0x1b] ss:$0 sm:$0xff] }
 0x1fb   :  { %v724_v1 = vadd.f32 %v720_v48, %v709_v32  ;;  %v704_v61 = vmul.f32 %v1657_v39, %v1684_v31  ;;  %v750_v27 = vmul.f32 %v1596_v36, %v1579_v2  ;;  %v778_v34 = vmul.f32 %v1693_v5, %v652_v17  ;;  %v787_v32 = vld [vmem:[#allocation2 + $0x23] sm:$0xff] }
 0x1fc   :  { %v620_v7 = vadd.f32 %v616_v25, %v605_v8  ;;  %v678_v0 = vadd.f32 %v674_v58, %v663_v16  ;;  %v767_v11 = vadd.f32 %v763_v18, %v752_v12  ;;  %v661_v3 = vmul.f32 %v1638_v56, %v653_v35  ;;  %v713_v58 = vld [vmem:[#allocation2 + $0x4e] sm:$0xff] }
 0x1fd   :  { %v739_v28 = vadd.f32 %v735_v52, %v724_v1  ;;  %v719_v6 = vmul.f32 %v1664_v47, %v1695_v49  ;;  %v765_v63 = vmul.f32 %v1682_v30, %v638_v59  ;;  %v793_v45 = vmul.f32 %v1702_v23, %v667_v26  ;;  %v802_v1 = vld [vmem:[#allocation2 + $0x24] sm:$0xff] }
 0x1fe   :  { %v635_v38 = vadd.f32 %v631_v10, %v620_v7  ;;  %v693_v55 = vadd.f32 %v689_v43, %v678_v0  ;;  %v782_v15 = vadd.f32 %v778_v34, %v767_v11  ;;  %v676_v36 = vmul.f32 %v1644_v44, %v668_v41  ;;  %v1151_v7 = vld [vmem:[#allocation11 + $0x1c] ss:$0 sm:$0xff]  ;;  %v728_v43 = vld [vmem:[#allocation2 + $0x4f] sm:$0xff] }
 0x1ff   :  { %v754_v14 = vadd.f32 %v750_v27, %v739_v28  ;;  %v734_v56 = vmul.f32 %v1670_v60, %v1704_v57  ;;  %v764_v21 = vmul.f32 %v1682_v30, %v757_v9  ;;  %v780_v8 = vmul.f32 %v1693_v5, %v653_v35  ;;  %v1152_v27 = vld [vmem:[#allocation11 + $0x1d] ss:$0 sm:$0xff]  ;;  %v773_v34 = vld [vmem:[#allocation2 + $0x52] sm:$0xff] }
 0x200   :  { %v650_v37 = vadd.f32 %v646_v54, %v635_v38  ;;  %v708_v33 = vadd.f32 %v704_v61, %v693_v55  ;;  %v797_v25 = vadd.f32 %v793_v45, %v782_v15  ;;  %v691_v26 = vmul.f32 %v1651_v22, %v683_v50  ;;  %v758_v38 = vld [vmem:[#allocation2 + $0x51] sm:$0xff]  ;;  %v817_v61 = vld [vmem:[#allocation2 + $0x25] sm:$0xff] }
 0x201   :  { %v769_v51 = vadd.f32 %v765_v63, %v754_v14  ;;  %v808_v44 = vmul.f32 %v1714_v4, %v1676_v46  ;;  %v779_v48 = vmul.f32 %v1693_v5, %v772_v19  ;;  %v795_v62 = vmul.f32 %v1702_v23, %v668_v41  ;;  %v788_v63 = vld [vmem:[#allocation2 + $0x53] sm:$0xff]  ;;  %v847_v45 = vld [vmem:[#allocation2 + $0x27] sm:$0xff] }
 0x202   :  { %v665_v2 = vadd.f32 %v661_v3, %v650_v37  ;;  %v723_v17 = vadd.f32 %v719_v6, %v708_v33  ;;  %v706_v0 = vmul.f32 %v1657_v39, %v698_v24  ;;  %v721_v52 = vmul.f32 %v1664_v47, %v713_v58  ;;  %v832_v33 = vld [vmem:[#allocation2 + $0x26] sm:$0xff] }
 0x203   :  { %v784_v20 = vadd.f32 %v780_v8, %v769_v51  ;;  %v812_v22 = vadd.f32 %v808_v44, %v797_v25  ;;  %v794_v12 = vmul.f32 %v1702_v23, %v787_v32  ;;  %v810_v55 = vmul.f32 %v1714_v4, %v683_v50  ;;  %v833_v32 = vld [vmem:[#allocation2 + $0x56] sm:$0xff] }
 0x204   :  { %v680_v16 = vadd.f32 %v676_v36, %v665_v2  ;;  %v738_v59 = vadd.f32 %v734_v56, %v723_v17  ;;  %v823_v41 = vmul.f32 %v1151_v7, %v1684_v31  ;;  %v736_v39 = vmul.f32 %v1670_v60, %v728_v43  ;;  %v1153_v36 = vld [vmem:[#allocation11 + $0x1e] ss:$0 sm:$0xff]  ;;  %v803_v56 = vld [vmem:[#allocation2 + $0x54] sm:$0xff] }
 0x205   :  { %v799_v18 = vadd.f32 %v795_v62, %v784_v20  ;;  %v809_v28 = vmul.f32 %v1714_v4, %v802_v1  ;;  %v766_v6 = vmul.f32 %v1682_v30, %v758_v38  ;;  %v824_v9 = vmul.f32 %v1151_v7, %v817_v61 }
 0x206   :  { %v695_v10 = vadd.f32 %v691_v26, %v680_v16  ;;  %v753_v35 = vadd.f32 %v1601_v42, %v738_v59  ;;  %v827_v3 = vadd.f32 %v823_v41, %v812_v22  ;;  %v825_v15 = vmul.f32 %v1151_v7, %v698_v24  ;;  %v818_v59 = vld [vmem:[#allocation2 + $0x55] sm:$0xff] }
 0x207   :  { %v814_v47 = vadd.f32 %v810_v55, %v799_v18  ;;  %v838_v31 = vmul.f32 %v1152_v27, %v1695_v49  ;;  %v781_v60 = vmul.f32 %v1693_v5, %v773_v34  ;;  %v839_v2 = vmul.f32 %v1152_v27, %v832_v33 }
 0x208   :  { %v710_v46 = vadd.f32 %v706_v0, %v695_v10  ;;  %v768_v54 = vadd.f32 %v764_v21, %v753_v35  ;;  %v796_v30 = vmul.f32 %v1702_v23, %v788_v63  ;;  %v854_v8 = vmul.f32 %v1153_v36, %v847_v45  ;;  %v848_v23 = vld [vmem:[#allocation2 + $0x57] sm:$0xff] }
 0x209   :  { %v829_v21 = vadd.f32 %v825_v15, %v814_v47  ;;  %v842_v51 = vadd.f32 %v838_v31, %v827_v3  ;;  %v840_v26 = vmul.f32 %v1152_v27, %v713_v58  ;;  %v853_v24 = vmul.f32 %v1153_v36, %v1704_v57 }
 0x20a   :  { %v725_v11 = vadd.f32 %v721_v52, %v710_v46  ;;  %v783_v37 = vadd.f32 %v779_v48, %v768_v54  ;;  %v811_v49 = vmul.f32 %v1714_v4, %v803_v56  ;;  %v826_v62 = vmul.f32 %v1151_v7, %v818_v59  ;;  %v1155_v59 = vld [vmem:[#allocation11 + $0x22] ss:$0 sm:$0xff] }
 0x20b   :  { %v844_v48 = vadd.f32 %v840_v26, %v829_v21  ;;  %v855_v10 = vmul.f32 %v1153_v36, %v728_v43  ;;  %v841_v35 = vmul.f32 %v1152_v27, %v833_v32  ;;  %v856_v4 = vmul.f32 %v1153_v36, %v848_v23 }
 0x20c   :  { %v740_v14 = vadd.f32 %v736_v39, %v725_v11  ;;  %v798_v50 = vadd.f32 %v794_v12, %v783_v37 }
 0x20d   :  { %v859_v22 = vadd.f32 %v855_v10, %v844_v48 }
 0x20e   :  { %v755_v17 = vadd.f32 %v1601_v42, %v740_v14  ;;  %v813_v19 = vadd.f32 %v809_v28, %v798_v50  ;;  %v857_v42 = vadd.f32 %v853_v24, %v842_v51 }
 0x20f   :  { %v863_v46 = vmul.f32 %v1558_v40, %v859_v22 }
 0x210   :  { %v770_v25 = vadd.f32 %v766_v6, %v755_v17  ;;  %v828_v16 = vadd.f32 %v824_v9, %v813_v19  ;;  %v861_v58 = vmul.f32 %v1536_v13, %v857_v42 }
 0x211   :  { %v876_v41 = vmul.f32 %v863_v46, %v863_v46 }
 0x212   :  { %v785_v5 = vadd.f32 %v781_v60, %v770_v25  ;;  %v843_v44 = vadd.f32 %v839_v2, %v828_v16  ;;  %v874_v54 = vmul.f32 %v861_v58, %v861_v58  ;;  %v1154_v25 = vld [vmem:[#allocation11 + $0x21] ss:$0 sm:$0xff] }
 0x214   :  { %v800_v20 = vadd.f32 %v796_v30, %v785_v5  ;;  %v858_v0 = vadd.f32 %v854_v8, %v843_v44 }
 0x216   :  { %v815_v1 = vadd.f32 %v811_v49, %v800_v20  ;;  %v862_v57 = vmul.f32 %v1548_v29, %v858_v0 }
 0x218   :  { %v830_v52 = vadd.f32 %v826_v62, %v815_v1  ;;  %v875_v12 = vmul.f32 %v862_v57, %v862_v57  ;;  %v865_v38 = vadd.f32 %v862_v57, %v861_v58 }
 0x21a   :  { %v845_v18 = vadd.f32 %v841_v35, %v830_v52  ;;  %v878_v7 = vadd.f32 %v875_v12, %v874_v54  ;;  %v866_v61 = vadd.f32 %v865_v38, %v863_v46 }
 0x21c   :  { %v860_v55 = vadd.f32 %v856_v4, %v845_v18  ;;  %v879_v27 = vadd.f32 %v878_v7, %v876_v41 }
 0x21e   :  { %v864_v43 = vmul.f32 %v1572_v53, %v860_v55 }
 0x220   :  { %v867_v39 = vadd.f32 %v866_v61, %v864_v43  ;;  %v877_v28 = vmul.f32 %v864_v43, %v864_v43 }
 0x222   :  { %v868_v11 = vrot.slane %v867_v39, 4  ;;  %v880_v34 = vadd.f32 %v879_v27, %v877_v28 }
 0x224   :  { %v869_v37 = vadd.f32 %v868_v11, %v867_v39  ;;  %v881_v47 = vrot.slane %v880_v34, 4  ;;  %v1160_v11 = vld [vmem:[#allocation11 + $0x23] ss:$0 sm:$0xff] }
 0x226   :  { %v870_v3 = vrot.slane %v869_v37, 2  ;;  %v882_v33 = vadd.f32 %v881_v47, %v880_v34 }
 0x228   :  { %v871_v6 = vadd.f32 %v870_v3, %v869_v37  ;;  %v883_v9 = vrot.slane %v882_v33, 2 }
 0x22a   :  { %v872_v14 = vrot.slane %v871_v6, 1  ;;  %v884_v63 = vadd.f32 %v883_v9, %v882_v33 }
 0x22c   :  { %v873_v50 = vadd.f32 %v872_v14, %v871_v6  ;;  %v885_v15 = vrot.slane %v884_v63, 1 }
 0x22e   :  { %v886_v31 = vadd.f32 %v885_v15, %v884_v63  ;;  %v887_v45 = vmul.f32 0.03125, %v873_v50 }
 0x230   :  { %v888_v60 = vmul.f32 0.03125, %v886_v31  ;;  %v889_v2 = vmul.f32 %v887_v45, %v887_v45  ;;  %v892_v19 = vsub.f32 %v861_v58, %v887_v45  ;;  %v893_v21 = vsub.f32 %v862_v57, %v887_v45 }
 0x231   :  { %v894_v51 = vsub.f32 %v863_v46, %v887_v45  ;;  %v895_v30 = vsub.f32 %v864_v43, %v887_v45 }
 0x232   :  { %v890_v36 = vsub.f32 %v888_v60, %v889_v2 }
 0x234   :  { %v891_v17 = vmax.f32 %v890_v36, 0.0 }
 0x236   :  { %v896_v56 = vadd.f32 1e-05, %v891_v17 }
 0x238   :  { %1267 = vrsqrt.f32 %v896_v56 }
 0x245   :  { %v1268_v8 = vpop.eup %1267 }
 0x246   :  { %v898_v16 = vmul.f32 %v1268_v8, %v892_v19  ;;  %v899_v26 = vmul.f32 %v1268_v8, %v893_v21  ;;  %v900_v24 = vmul.f32 %v1268_v8, %v894_v51  ;;  %v901_v49 = vmul.f32 %v1268_v8, %v895_v30 }
 0x248   :  { %v907_v5 = vmul.f32 %v1154_v25, %v898_v16  ;;  %v908_v32 = vmul.f32 %v1154_v25, %v899_v26  ;;  %v909_v44 = vmul.f32 %v1154_v25, %v900_v24  ;;  %v910_v48 = vmul.f32 %v1154_v25, %v901_v49 }
 0x24a   :  { %v916_v42 = vadd.f32 %v1155_v59, %v907_v5  ;;  %v917_v20 = vadd.f32 %v1155_v59, %v908_v32  ;;  %v918_v62 = vadd.f32 %v1155_v59, %v909_v44  ;;  %v919_v10 = vadd.f32 %v1155_v59, %v910_v48 }
 0x24c   :  { %v1156_v0 = vmul.f32 -1.442695, %v916_v42  ;;  %v1157_v35 = vmul.f32 -1.442695, %v917_v20  ;;  %v1158_v23 = vmul.f32 -1.442695, %v918_v62 }
 0x24d   :  { %v1159_v1 = vmul.f32 -1.442695, %v919_v10 }
 0x24e   :  { %1269 = vpow2.f32 %v1156_v0 }
 0x24f   :  { %1271 = vpow2.f32 %v1157_v35 }
 0x250   :  { %1273 = vpow2.f32 %v1158_v23 }
 0x251   :  { %1275 = vpow2.f32 %v1159_v1 }
 0x25b   :  { %v1270_v22 = vpop.eup %1269 }
 0x25c   :  { %v1272_v58 = vpop.eup %1271  ;;  %v932_v57 = vadd.f32 1.0, %v1270_v22 }
 0x25d   :  { %v1274_v52 = vpop.eup %1273  ;;  %v933_v4 = vadd.f32 1.0, %v1272_v58 }
 0x25e   :  { %v1276_v12 = vpop.eup %1275  ;;  %1277 = vrcp.f32 %v932_v57  ;;  %v934_v18 = vadd.f32 1.0, %v1274_v52 }
 0x25f   :  { %1279 = vrcp.f32 %v933_v4  ;;  %v935_v46 = vadd.f32 1.0, %v1276_v12 }
 0x260   :  { %1281 = vrcp.f32 %v934_v18 }
 0x261   :  { %1283 = vrcp.f32 %v935_v46 }
 0x26b   :  { %v1278_v38 = vpop.eup %1277 }
 0x26c   :  { %v1280_v54 = vpop.eup %1279  ;;  %v944_v55 = vmul.f32 %v1278_v38, %v916_v42 }
 0x26d   :  { %v1282_v7 = vpop.eup %1281  ;;  %v945_v43 = vmul.f32 %v1280_v54, %v917_v20 }
 0x26e   :  { %v1284_v61 = vpop.eup %1283  ;;  %v946_v41 = vmul.f32 %v1282_v7, %v918_v62 }
 0x26f   :  { %v948_v39 = vpack.c.bf16 %v945_v43, %v944_v55  ;;  %v947_v28 = vmul.f32 %v1284_v61, %v919_v10 }
 0x271   :  { %1195 = vmatprep.mubr.bf16.mxu1 %v948_v39  ;;  %v949_v27 = vpack.c.bf16 %v947_v28, %v946_v41 }
 0x273   :  { %1196 = vmatmul.mubr.bf16.vlgmr.msra.gmra.mxu1 %v949_v27 }
 0x333   :  { %v1197_v34 = vpop.f32.mrf.mxu1 }
 0x334   :  { %v1062_v37 = vadd.f32 %v1197_v34, %v1160_v11 }
 0x335   :  { %v1053_v47 = vpop.f32.mrf.mxu1 }
 0x336   :  { %v1070_v3 = vmul.f32 %v1558_v40, %v1062_v37  ;;  %v1054_v33 = vadd.f32 %v1160_v11, %v1053_v47 }
 0x337   :  { %v1198_v6 = vpop.f32.mrf.mxu1 }
 0x338   :  { %1074 = vst [vmem:[#allocation13 + $0x10] sm:$0xff] %v1070_v3  ;;  %v1068_v9 = vmul.f32 %v1536_v13, %v1054_v33  ;;  %v1065_v14 = vadd.f32 %v1198_v6, %v1160_v11 }
 0x339   :  { %v1056_v63 = vpop.f32.mrf.mxu1 }
 0x33a   :  { %1072 = vst [vmem:[#allocation13] sm:$0xff] %v1068_v9  ;;  %v1071_v50 = vmul.f32 %v1572_v53, %v1065_v14  ;;  %v1057_v15 = vadd.f32 %v1160_v11, %v1056_v63 }
 0x33c   :  { %1075 = vst [vmem:[#allocation13 + $0x18] sm:$0xff] %v1071_v50  ;;  %v1069_v31 = vmul.f32 %v1548_v29, %v1057_v15 }
 0x33e   :  { %1073 = vst [vmem:[#allocation13 + $0x8] sm:$0xff] %v1069_v31 }
 0x33f   :  { %1384 = shalt.err (!%p1381_p10)
}
 0x340   :  { %1087 = dma.vmem_to_hbm [thread:$0]  %s1082_s18, 512, %s1760_s5, [#allocation5], %s1405_s23, %s1405_s23, %s1406_s24  }
 0x341   :  { %1401 = dma.done.wait [#allocation5], 512  }
 0x342   :  { %1402 = vsyncadd [#allocation5], 4294966784 }
 0x343   :  { %1091 = vsyncpa [#allocation4], 1 }
 0x344   :  { %1092 = vsyncpa [#allocation9], 1 }
 0x345   :  { %1093 = vsyncpa [#allocation12], 1 }
 0x346   :  { %1094 = vsyncpa [#allocation5], 1 }
 0x347   :  { %1095 = vsyncpa [#allocation6], 1 }

</bundles_post_ra>
